<compile_context>
chip_gen: v6e
topology: v6e:2x2x1
jax: 0.10.0
libtpu: 0.0.40
codegen_flags: <defaults>
</compile_context>

<pallas_src>
import functools

import jax
import jax.numpy as jnp
from jax.experimental import pallas as pl
from jax.experimental.pallas import tpu as pltpu


def _round_up(x, m):
    return ((x + m - 1) // m) * m


def _amp_style_cat_kernel(n_style, w_meta, b_meta,
                          obs_ref, lat_ref, bias_ref, w_ref, out_ref):
    """Fused forward: style MLP -> tanh style head -> concat -> dense MLP.

    obs_ref  (TILE_B, obs_size)      f32   batch-tiled (streamed)
    lat_ref  (TILE_B, latent_size)   f32   batch-tiled (streamed)
    bias_ref (1, bias_slab_w)        f32   resident (all biases, lane-aligned)
    w_ref    (slab_rows, slab_w)     bf16  resident (all weights, one slab)
    out_ref  (TILE_B, units[-1])     f32   batch-tiled
    """

    def weight(i):
        off, k, n = w_meta[i]           # static, sublane-aligned offset
        return w_ref[off:off + k, :n]

    def bias(i):
        off, n = b_meta[i]              # static, 128-lane-aligned offset
        return bias_ref[:, off:off + n]

    n_layers = len(w_meta)
    n_dense = n_layers - n_style - 1
    li = 0

    # --- eval_style: style MLP (ReLU), bf16 activations between layers ---
    h = lat_ref[...].astype(jnp.bfloat16)
    for _ in range(n_style):
        z = jnp.dot(h, weight(li), preferred_element_type=jnp.float32) + bias(li)
        h = jnp.maximum(z, 0.0).astype(jnp.bfloat16)
        li += 1

    # --- style head: tanh(Linear) ---
    z = jnp.dot(h, weight(li), preferred_element_type=jnp.float32) + bias(li)
    style = jnp.tanh(z).astype(jnp.bfloat16)
    li += 1

    # --- h = cat([obs, style]) as an in-VMEM lane concat, single K dot ---
    h = jnp.concatenate([obs_ref[...].astype(jnp.bfloat16), style], axis=-1)
    for j in range(n_dense):
        z = jnp.dot(h, weight(li), preferred_element_type=jnp.float32) + bias(li)
        a = jnp.maximum(z, 0.0)
        li += 1
        # bf16 intermediates; the final layer stays f32 for the output store.
        h = a.astype(jnp.bfloat16) if j + 1 < n_dense else a

    out_ref[...] = h.astype(out_ref.dtype)


def _pack_biases(biases):
    """Pack per-layer biases into one lane-aligned f32 slab (single DMA)."""
    meta, segs, off = [], [], 0
    for b in biases:
        n = int(b.shape[-1])
        seg_w = _round_up(n, 128)
        seg = jnp.zeros((1, seg_w), jnp.float32).at[:, :n].set(
            b.reshape(1, n).astype(jnp.float32))
        segs.append(seg)
        meta.append((off, n))
        off += seg_w
    return jnp.concatenate(segs, axis=-1), tuple(meta)


def _pack_weights(weights):
    """Pack all (in, out) weights into one resident bf16 slab.

    Each weight is zero-padded to (round_up(in, 16), lane_w) and stacked along
    sublanes; offsets stay multiples of 16 (bf16 packing)."""
    lane_w = _round_up(max(int(w.shape[1]) for w in weights), 128)
    meta, blocks, off = [], [], 0
    for w in weights:
        k, n = int(w.shape[0]), int(w.shape[1])
        k_pad = _round_up(k, 16)
        blk = jnp.zeros((k_pad, lane_w), jnp.bfloat16).at[:k, :n].set(
            w.astype(jnp.bfloat16))
        blocks.append(blk)
        meta.append((off, k, n))
        off += k_pad
    return jnp.concatenate(blocks, axis=0), tuple(meta)


def init_params(key, obs_size, latent_size, style_units, style_dim, units):
    """Mirrors AMPStyleCatNet1.init_params(): generic (scaled uniform) init on
    Linear weights, zero biases, uniform(-1, 1) on the style_dense weight.
    Weights are stored transposed (in, out) so forward is `h @ W + b`."""
    params = {"style": [], "dense": []}
    keys = jax.random.split(key, len(style_units) + 1 + len(units))
    ki = 0

    in_size = latent_size
    for u in style_units:
        bound = 1.0 / jnp.sqrt(in_size)
        w = jax.random.uniform(keys[ki], (in_size, u), jnp.float32,
                               -bound, bound)
        b = jnp.zeros((1, u), jnp.float32)
        params["style"].append((w, b))
        in_size = u
        ki += 1

    params["style_dense"] = (
        jax.random.uniform(keys[ki], (in_size, style_dim), jnp.float32,
                           -1.0, 1.0),
        jnp.zeros((1, style_dim), jnp.float32),
    )
    ki += 1

    in_size = obs_size + style_dim
    for u in units:
        bound = 1.0 / jnp.sqrt(in_size)
        w = jax.random.uniform(keys[ki], (in_size, u), jnp.float32,
                               -bound, bound)
        b = jnp.zeros((1, u), jnp.float32)
        params["dense"].append((w, b))
        in_size = u
        ki += 1

    return params


def amp_style_cat_net_forward(obs, latent, params, *, tile_b=1024):
    """Batch-gridded fused Pallas forward (skip_style=False path, ReLU)."""
    n_style = len(params["style"])
    batch, obs_size = obs.shape
    latent_size = latent.shape[1]
    out_dim = int(params["dense"][-1][0].shape[1])
    style_dim = int(params["style_dense"][0].shape[1])

    # Batch tile: multiple of 8 (f32 sublane). Large tiles amortize the
    # ~0.35us/grid-step overhead; cap so the grid keeps >=2-4 steps so
    # dimension_semantics=("parallel",) can feed both TensorCores on v7x,
    # and never exceed the (rounded-up) batch.
    tile_b = _round_up(max(8, min(tile_b, 2048)), 8)
    tile_b = min(tile_b, _round_up(max(256, pl.cdiv(batch, 4)), 8))
    tile_b = min(tile_b, _round_up(batch, 8))
    grid = (pl.cdiv(batch, tile_b),)

    # Resident parameter slabs: one bf16 weight slab + one f32 bias slab,
    # sliced with static aligned offsets inside the kernel.
    weights = ([w for (w, _) in params["style"]]
               + [params["style_dense"][0]]
               + [w for (w, _) in params["dense"]])
    biases = ([b for (_, b) in params["style"]]
              + [params["style_dense"][1]]
              + [b for (_, b) in params["dense"]])
    w_slab, w_meta = _pack_weights(weights)
    bias_slab, b_meta = _pack_biases(biases)

    kernel = functools.partial(_amp_style_cat_kernel, n_style, w_meta, b_meta)

    in_specs = [
        pl.BlockSpec((tile_b, obs_size), lambda i: (i, 0)),      # streamed
        pl.BlockSpec((tile_b, latent_size), lambda i: (i, 0)),   # streamed
        pl.BlockSpec(bias_slab.shape, lambda i: (0, 0)),         # resident
        pl.BlockSpec(w_slab.shape, lambda i: (0, 0)),            # resident
    ]
    out_specs = pl.BlockSpec((tile_b, out_dim), lambda i: (i, 0))

    # Cost estimate so XLA schedules the custom call sensibly.
    flops = 2 * batch * sum(k * n for (_, k, n) in w_meta)
    bytes_accessed = (obs.size * obs.dtype.itemsize
                      + latent.size * latent.dtype.itemsize
                      + batch * out_dim * 4
                      + w_slab.size * 2 + bias_slab.size * 4)
    cost = pl.CostEstimate(flops=flops, transcendentals=batch * style_dim,
                           bytes_accessed=bytes_accessed)

    # VMEM: resident slabs + double-buffered activation tiles + intermediate
    # headroom. Real footprint is a few MiB; keep the limit tight (v7x has
    # 64 MiB physical / 32 MiB default scoped shared with neighbor fusions).
    vmem_need = (w_slab.size * 2 + bias_slab.size * 4
                 + 2 * tile_b * (obs_size + latent_size) * 4
                 + 2 * tile_b * out_dim * 4
                 + 6 * tile_b * 128 * 4)
    vmem_limit = int(min(32 * 2**20, max(2 * 2**20, 4 * vmem_need)))

    # TODO(synk): output kept f32 to match the PyTorch module; emit bf16 if
    # the consumer tolerates it (halves store bytes; helps v5e most).
    return pl.pallas_call(
        kernel,
        grid=grid,
        out_shape=jax.ShapeDtypeStruct((batch, out_dim), jnp.float32),
        in_specs=in_specs,
        out_specs=out_specs,
        compiler_params=pltpu.CompilerParams(
            dimension_semantics=("parallel",),
            vmem_limit_bytes=vmem_limit),
        cost_estimate=cost,
    )(obs, latent, bias_slab, w_slab)


def reference_forward(obs, latent, params, skip_style=False):
    """Pure-JAX f32 reference matching the PyTorch forward."""
    if skip_style:
        style = latent
    else:
        h = latent
        for w, b in params["style"]:
            h = jnp.maximum(h @ w + b, 0.0)
        sw, sb = params["style_dense"]
        style = jnp.tanh(h @ sw + sb)
    h = jnp.concatenate([obs, style], axis=-1)
    for w, b in params["dense"]:
        h = jnp.maximum(h @ w + b, 0.0)
    return h


if __name__ == "__main__":
    # Small, module-consistent shapes; batch deliberately not a multiple of
    # the tile so the masked partial final block is exercised (300 -> tile
    # 256, grid of 2, second block has 44 valid rows).
    batch = 300
    obs_size = 32
    ase_latent_size = 24
    style_units = (32, 32)
    style_dim = 16
    units = (64, 32)

    key = jax.random.PRNGKey(0)
    k_obs, k_lat, k_params = jax.random.split(key, 3)

    obs = jax.random.normal(k_obs, (batch, obs_size), jnp.float32)
    latent = jax.random.normal(k_lat, (batch, ase_latent_size), jnp.float32)
    params = init_params(
        k_params, obs_size, ase_latent_size, style_units, style_dim, units
    )

    out = amp_style_cat_net_forward(obs, latent, params)
    out = jax.block_until_ready(out)

    ref = reference_forward(obs, latent, params)
    assert out.shape == (batch, units[-1]), out.shape
    # bf16 weights/activations (f32 accumulation) -> loosened tolerance.
    max_err = float(jnp.max(jnp.abs(out - ref)))
    assert jnp.allclose(out, ref, atol=5e-2, rtol=5e-2), max_err

    # TODO(synk): skip_style=True branch (style := latent) is a trivial
    # variant; only the skip_style=False path is exercised here.
    print("KERNEL_OK")
</pallas_src>

<mosaic_0001>
module attributes {stable_mosaic.version = 11 : i64} {
  func.func @_amp_style_cat_kernel(%arg0: i32, %arg1: memref<256x32xf32, #tpu.memory_space<vmem>>, %arg2: memref<256x24xf32, #tpu.memory_space<vmem>>, %arg3: memref<1x640xf32, #tpu.memory_space<vmem>>, %arg4: memref<208x128xbf16, #tpu.memory_space<vmem>>, %arg5: memref<256x32xf32, #tpu.memory_space<vmem>>) attributes {dimension_semantics = [#tpu.dimension_semantics<parallel>], iteration_bounds = array<i64: 2>, scalar_prefetch = 0 : i64, scratch_operands = 0 : i64, tpu.core_type = #tpu.core_type<tc>, window_params = [{transform_indices = @transform_0, window_bounds = array<i64: 256, 32>}, {transform_indices = @transform_1, window_bounds = array<i64: 256, 24>}, {pipeline_mode = #tpu.pipeline_mode<synchronous>, transform_indices = @transform_2, window_bounds = array<i64: 1, 640>}, {pipeline_mode = #tpu.pipeline_mode<synchronous>, transform_indices = @transform_3, window_bounds = array<i64: 208, 128>}, {transform_indices = @transform_4, window_bounds = array<i64: 256, 32>}]} {
    %c0 = arith.constant 0 : index
    %c0_0 = arith.constant 0 : index
    %0 = vector.load %arg2[%c0, %c0_0] : memref<256x24xf32, #tpu.memory_space<vmem>>, vector<256x24xf32>
    %1 = arith.truncf %0 : vector<256x24xf32> to vector<256x24xbf16>
    %c0_1 = arith.constant 0 : index
    %c0_2 = arith.constant 0 : index
    %2 = vector.load %arg4[%c0_1, %c0_2] : memref<208x128xbf16, #tpu.memory_space<vmem>>, vector<24x32xbf16>
    %cst = arith.constant dense<0.000000e+00> : vector<256x32xf32>
    %3 = tpu.matmul %1, %2, %cst {dimension_numbers = #tpu.dot_dimension_numbers<[1], [0], [0], [1], [0, 0, 1, 1], [], []>} : vector<256x24xbf16>, vector<24x32xbf16>, vector<256x32xf32> -> vector<256x32xf32>
    %c0_3 = arith.constant 0 : index
    %c0_4 = arith.constant 0 : index
    %4 = vector.load %arg3[%c0_3, %c0_4] : memref<1x640xf32, #tpu.memory_space<vmem>>, vector<1x32xf32>
    %5 = vector.broadcast %4 : vector<1x32xf32> to vector<256x32xf32>
    %6 = arith.addf %3, %5 : vector<256x32xf32>
    %cst_5 = arith.constant 0.000000e+00 : f32
    %7 = vector.broadcast %cst_5 : f32 to vector<256x32xf32>
    %8 = arith.maximumf %6, %7 : vector<256x32xf32>
    %9 = arith.truncf %8 : vector<256x32xf32> to vector<256x32xbf16>
    %c32 = arith.constant 32 : index
    %c0_6 = arith.constant 0 : index
    %10 = vector.load %arg4[%c32, %c0_6] : memref<208x128xbf16, #tpu.memory_space<vmem>>, vector<32x32xbf16>
    %cst_7 = arith.constant dense<0.000000e+00> : vector<256x32xf32>
    %11 = tpu.matmul %9, %10, %cst_7 {dimension_numbers = #tpu.dot_dimension_numbers<[1], [0], [0], [1], [0, 0, 1, 1], [], []>} : vector<256x32xbf16>, vector<32x32xbf16>, vector<256x32xf32> -> vector<256x32xf32>
    %c0_8 = arith.constant 0 : index
    %c128 = arith.constant 128 : index
    %12 = vector.load %arg3[%c0_8, %c128] : memref<1x640xf32, #tpu.memory_space<vmem>>, vector<1x32xf32>
    %13 = vector.broadcast %12 : vector<1x32xf32> to vector<256x32xf32>
    %14 = arith.addf %11, %13 : vector<256x32xf32>
    %cst_9 = arith.constant 0.000000e+00 : f32
    %15 = vector.broadcast %cst_9 : f32 to vector<256x32xf32>
    %16 = arith.maximumf %14, %15 : vector<256x32xf32>
    %17 = arith.truncf %16 : vector<256x32xf32> to vector<256x32xbf16>
    %c64 = arith.constant 64 : index
    %c0_10 = arith.constant 0 : index
    %18 = vector.load %arg4[%c64, %c0_10] : memref<208x128xbf16, #tpu.memory_space<vmem>>, vector<32x16xbf16>
    %cst_11 = arith.constant dense<0.000000e+00> : vector<256x16xf32>
    %19 = tpu.matmul %17, %18, %cst_11 {dimension_numbers = #tpu.dot_dimension_numbers<[1], [0], [0], [1], [0, 0, 1, 1], [], []>} : vector<256x32xbf16>, vector<32x16xbf16>, vector<256x16xf32> -> vector<256x16xf32>
    %c0_12 = arith.constant 0 : index
    %c256 = arith.constant 256 : index
    %20 = vector.load %arg3[%c0_12, %c256] : memref<1x640xf32, #tpu.memory_space<vmem>>, vector<1x16xf32>
    %21 = vector.broadcast %20 : vector<1x16xf32> to vector<256x16xf32>
    %22 = arith.addf %19, %21 : vector<256x16xf32>
    %23 = math.tanh %22 : vector<256x16xf32>
    %24 = arith.truncf %23 : vector<256x16xf32> to vector<256x16xbf16>
    %c0_13 = arith.constant 0 : index
    %c0_14 = arith.constant 0 : index
    %25 = vector.load %arg1[%c0_13, %c0_14] : memref<256x32xf32, #tpu.memory_space<vmem>>, vector<256x32xf32>
    %26 = arith.truncf %25 : vector<256x32xf32> to vector<256x32xbf16>
    %27 = tpu.concatenate %26, %24 in 1 : vector<256x32xbf16>, vector<256x16xbf16> -> vector<256x48xbf16>
    %c96 = arith.constant 96 : index
    %c0_15 = arith.constant 0 : index
    %28 = vector.load %arg4[%c96, %c0_15] : memref<208x128xbf16, #tpu.memory_space<vmem>>, vector<48x64xbf16>
    %cst_16 = arith.constant dense<0.000000e+00> : vector<256x64xf32>
    %29 = tpu.matmul %27, %28, %cst_16 {dimension_numbers = #tpu.dot_dimension_numbers<[1], [0], [0], [1], [0, 0, 1, 1], [], []>} : vector<256x48xbf16>, vector<48x64xbf16>, vector<256x64xf32> -> vector<256x64xf32>
    %c0_17 = arith.constant 0 : index
    %c384 = arith.constant 384 : index
    %30 = vector.load %arg3[%c0_17, %c384] : memref<1x640xf32, #tpu.memory_space<vmem>>, vector<1x64xf32>
    %31 = vector.broadcast %30 : vector<1x64xf32> to vector<256x64xf32>
    %32 = arith.addf %29, %31 : vector<256x64xf32>
    %cst_18 = arith.constant 0.000000e+00 : f32
    %33 = vector.broadcast %cst_18 : f32 to vector<256x64xf32>
    %34 = arith.maximumf %32, %33 : vector<256x64xf32>
    %35 = arith.truncf %34 : vector<256x64xf32> to vector<256x64xbf16>
    %c144 = arith.constant 144 : index
    %c0_19 = arith.constant 0 : index
    %36 = vector.load %arg4[%c144, %c0_19] : memref<208x128xbf16, #tpu.memory_space<vmem>>, vector<64x32xbf16>
    %cst_20 = arith.constant dense<0.000000e+00> : vector<256x32xf32>
    %37 = tpu.matmul %35, %36, %cst_20 {dimension_numbers = #tpu.dot_dimension_numbers<[1], [0], [0], [1], [0, 0, 1, 1], [], []>} : vector<256x64xbf16>, vector<64x32xbf16>, vector<256x32xf32> -> vector<256x32xf32>
    %c0_21 = arith.constant 0 : index
    %c512 = arith.constant 512 : index
    %38 = vector.load %arg3[%c0_21, %c512] : memref<1x640xf32, #tpu.memory_space<vmem>>, vector<1x32xf32>
    %39 = vector.broadcast %38 : vector<1x32xf32> to vector<256x32xf32>
    %40 = arith.addf %37, %39 : vector<256x32xf32>
    %cst_22 = arith.constant 0.000000e+00 : f32
    %41 = vector.broadcast %cst_22 : f32 to vector<256x32xf32>
    %42 = arith.maximumf %40, %41 : vector<256x32xf32>
    %c0_23 = arith.constant 0 : index
    %c0_24 = arith.constant 0 : index
    %43 = vector.load %arg5[%c0_23, %c0_24] : memref<256x32xf32, #tpu.memory_space<vmem>>, vector<256x32xf32>
    tpu.vector_store %arg5[%c0_23, %c0_24], %42 {strides = array<i32>} : memref<256x32xf32, #tpu.memory_space<vmem>>, vector<256x32xf32>,
    return
  }
  func.func @transform_0(%arg0: i32) -> (i32, i32) {
    %c0_i32 = arith.constant 0 : i32
    %c0_i32_0 = arith.constant 0 : i32
    return %arg0, %c0_i32 : i32, i32
  }
  func.func @transform_1(%arg0: i32) -> (i32, i32) {
    %c0_i32 = arith.constant 0 : i32
    %c0_i32_0 = arith.constant 0 : i32
    return %arg0, %c0_i32 : i32, i32
  }
  func.func @transform_2(%arg0: i32) -> (i32, i32) {
    %c0_i32 = arith.constant 0 : i32
    %c0_i32_0 = arith.constant 0 : i32
    %c0_i32_1 = arith.constant 0 : i32
    return %c0_i32, %c0_i32_0 : i32, i32
  }
  func.func @transform_3(%arg0: i32) -> (i32, i32) {
    %c0_i32 = arith.constant 0 : i32
    %c0_i32_0 = arith.constant 0 : i32
    %c0_i32_1 = arith.constant 0 : i32
    return %c0_i32, %c0_i32_0 : i32, i32
  }
  func.func @transform_4(%arg0: i32) -> (i32, i32) {
    %c0_i32 = arith.constant 0 : i32
    %c0_i32_0 = arith.constant 0 : i32
    return %arg0, %c0_i32 : i32, i32
  }
}

</mosaic_0001>

<bundles_post_ra>
// kernel: tpu_custom_call.1
= control target key start
LH: loop header
LB: loop body
LE: loop exit
PB: predicated region body
PF: predicated region fallthrough
CT: control target
= control target key end

     0   :  { %s2926_s15 = smov 0   ;;  %s2928_s16 = smov 0   ;;  %s3598_s0 = inlined_call_operand.vmem [shape: f32[300,32], index: 0, kind: input, shape index: {}]   ;;  %s3599_s1 = inlined_call_operand.vmem [shape: f32[300,24], index: 1, kind: input, shape index: {}]   ;;  %s3600_s2 = inlined_call_operand.vmem [shape: f32[1,640], index: 2, kind: input, shape index: {}]   ;;  %s3601_s3 = inlined_call_operand.vmem [shape: bf16[208,128], index: 3, kind: input, shape index: {}]   ;;  %s3602_s4 = inlined_call_operand.vmem [shape: f32[300,32], index: 4, kind: output, shape index: {}]  }
   0x1   :  { %s2930_s17 = smov 0  }
   0x2 LB: > { %s2939_s18 = sadd.s32 4294967295, %s2866_s17   ;;  %s2941_s19 = sadd.s32 1, %s2866_s17   ;;  %s2866_s17 = sphi %s2930_s17, %s3611_s17   ;;  %s2862_s16 = sphi %s2928_s16, %s3610_s16   ;;  %s2858_s15 = sphi %s2926_s15, %s3609_s15  }
   0x3   : > { %s112_s20 = ssub.s32 %s2866_s17, %s2941_s19  ;;  %s115_s21 = sadd.s32 1, %s2862_s16 }
   0x4   : > { %p113_p0 = scmp.eq.s32.totalorder %s112_s20, 0  ;;  %p125_p1 = scmp.ne.s32.totalorder %s2862_s16, %s2858_s15 }
   0x5   : > { %p126_p2 = scmp.eq.s32.totalorder %s2939_s18, 1  ;;  %p2237_p3 = scmp.ge.s32.totalorder %s2866_s17, 1 }
   0x6   : > { %s2949_s22 = scalar_select %p113_p0, %s2862_s16, %s115_s21  }
   0x7   : > { %p2951_p4 = por %p126_p2, %p125_p1  ;;  %p190_p5 = scmp.lt.s32.totalorder %s2866_s17, 3 }
   0x9   : > { %p191_p6 = pnand %p2237_p3, %p190_p5 }
   0xa   : > { %s2962_s28 = sshll.u32 (!%p191_p6), %s2939_s18, 5  ;;  %s2900_s11 = smov (!%p191_p6), 32  }
   0xb   : > { %194 = sbr.rel (%p191_p6) target bundleno = 1288 (0x508), region = 36  ;;  %p233_p7 = scmp.lt.s32.totalorder (!%p191_p6), %s2962_s28, 37 }
   0xc   : > { %s225_s5 = sand.u32 (!%p191_p6), 1, %s2858_s15  }
  0x10   : > { %v2735_v0 = vld [vmem:[%s3601_s3 + $0x8] ss:$0 sps:$4 sm:$0xff]   ;;  %vm378_vm0 = vcmask 1043456   ;;  %v2736_v1 = vld [vmem:[%s3601_s3] sm:$0xff]   ;;  %s2966_s29 = scalar_select %p233_p7, %s2962_s28, 37  ;;  %v2737_v3 = vld [vmem:[%s3601_s3 + $0x18] sm:$0xff]  }
  0x11   : > { %2644 = vmatprep.subr.msk.bf16.mxu0 %vm378_vm0, %v2735_v0  ;;  %v380_v2 = vsel %vm378_vm0, %v2735_v0, 0  ;;  %2645 = vmatprep.subr.msk.bf16.mxu1 %vm378_vm0, %v2735_v0  ;;  %vm329_vm1 = vcmask 195584   ;;  %v2738_v25 = vld [vmem:[%s3601_s3 + $0x10] sm:$0xff]   ;;  %v2739_v53 = vld [vmem:[%s3601_s3 + $0x28] sm:$0xff]   ;;  %v2740_v54 = vld [vmem:[%s3601_s3 + $0x20] sm:$0xff]   ;;  %vm614_vm2 = vcmask 261120  }
  0x12   : > { %2455 = vmatpush3.bf16.msra.mxu0 %v380_v2  ;;  %2642 = vmatpush3.bf16.msra.mxu1 %v380_v2  ;;  %s2240_s6 = sshll.u32 %s2966_s29, 3  ;;  %v3039_v57 = vld [vmem:[%s3600_s2] ss:$0 sm:$0xff]  ;;  %vm1327_vm3 = vcmask 392192   ;;  %vm1608_vm4 = vcmask 523264   ;;  %s1890_s15 = ssub.s32 (%p2951_p4), 38, %s2962_s28 }
  0x13   : > { %2456 = vmatprep.subr.bf16.mxu0 %v2736_v1  ;;  %2641 = vmatprep.subr.bf16.mxu1 %v2736_v1  ;;  %s2977_s9 = scalar_lea.vmem %s3599_s1, %s2240_s6  ;;  %s3236_s30 = scalar_lea.vmem %s3598_s0, %s2240_s6 }
  0x14   : > { %v262_v4 = vld [vmem:[%s2977_s9] sm:$0xff]  ;;  %v263_v5 = vld [vmem:[%s2977_s9 + $0x8] sm:$0xff]  ;;  %v264_v6 = vld [vmem:[%s2977_s9 + $0x10] sm:$0xff]  ;;  %p1891_p8 = scmp.lt.s32.totalorder (%p2951_p4), %s1890_s15, 32 }
  0x15   : > { %v294_v7 = vpack.c.bf16 %v263_v5, %v262_v4  ;;  %v265_v8 = vld [vmem:[%s2977_s9 + $0x18] sm:$0xff]  ;;  %v266_v9 = vld [vmem:[%s2977_s9 + $0x20] sm:$0xff]  ;;  %v267_v10 = vld [vmem:[%s2977_s9 + $0x28] sm:$0xff] }
  0x16   : > { %2457 = vmatpush3.bf16.msra.mxu0 %v2736_v1  ;;  %2643 = vmatpush3.bf16.msra.mxu1 %v2736_v1  ;;  %v295_v11 = vpack.c.bf16 %v265_v8, %v264_v6  ;;  %v296_v12 = vpack.c.bf16 %v267_v10, %v266_v9  ;;  %v268_v13 = vld [vmem:[%s2977_s9 + $0x30] sm:$0xff]  ;;  %v269_v14 = vld [vmem:[%s2977_s9 + $0x38] sm:$0xff]  ;;  %v270_v15 = vld [vmem:[%s2977_s9 + $0x40] sm:$0xff] }
  0x17   : > { %2490 = vmatprep.subr.bf16.mxu1 %v2737_v3  ;;  %2458 = vmatprep.mubr.msk.bf16.mxu0 %vm329_vm1, %v294_v7  ;;  %v271_v16 = vld [vmem:[%s2977_s9 + $0x48] sm:$0xff]  ;;  %v278_v17 = vld [vmem:[%s2977_s9 + $0x80] sm:$0xff]  ;;  %v280_v20 = vld [vmem:[%s2977_s9 + $0x90] sm:$0xff]  ;;  %v297_v26 = vpack.c.bf16 %v269_v14, %v268_v13 }
  0x18   : > { %v279_v18 = vld [vmem:[%s2977_s9 + $0x88] sm:$0xff]  ;;  %v281_v21 = vld [vmem:[%s2977_s9 + $0x98] sm:$0xff]  ;;  %v282_v22 = vld [vmem:[%s2977_s9 + $0xa0] sm:$0xff]  ;;  %v298_v28 = vpack.c.bf16 %v271_v16, %v270_v15  ;;  %2526 = vmatprep.subr.bf16.mxu0 %v2739_v53 }
  0x19   : > { %2459 = vmatmul.mubr.msk.bf16.vlgmr.msra.gmra.mxu0 %vm329_vm1, %v295_v11  ;;  %v302_v19 = vpack.c.bf16 %v279_v18, %v278_v17  ;;  %v303_v23 = vpack.c.bf16 %v281_v21, %v280_v20  ;;  %v283_v24 = vld [vmem:[%s2977_s9 + $0xa8] sm:$0xff]  ;;  %v284_v29 = vld [vmem:[%s2977_s9 + $0xb0] sm:$0xff]  ;;  %v285_v30 = vld [vmem:[%s2977_s9 + $0xb8] sm:$0xff] }
  0x1a   : > { %2462 = vmatprep.mubr.msk.bf16.mxu0 %vm329_vm1, %v296_v12  ;;  %v304_v27 = vpack.c.bf16 %v283_v24, %v282_v22  ;;  %v286_v31 = vld [vmem:[%s2977_s9 + $0xc0] sm:$0xff]  ;;  %v287_v32 = vld [vmem:[%s2977_s9 + $0xc8] sm:$0xff]  ;;  %v272_v33 = vld [vmem:[%s2977_s9 + $0x50] sm:$0xff]  ;;  %v305_v35 = vpack.c.bf16 %v285_v30, %v284_v29  ;;  %2527 = vmatpush3.bf16.msra.mxu0 %v2739_v53 }
  0x1b   : > { %2474 = vmatprep.mubr.msk.bf16.mxu1 %vm329_vm1, %v302_v19  ;;  %v273_v34 = vld [vmem:[%s2977_s9 + $0x58] sm:$0xff]  ;;  %v274_v36 = vld [vmem:[%s2977_s9 + $0x60] sm:$0xff]  ;;  %v275_v37 = vld [vmem:[%s2977_s9 + $0x68] sm:$0xff]  ;;  %v306_v38 = vpack.c.bf16 %v287_v32, %v286_v31  ;;  %2528 = vmatprep.subr.bf16.mxu0 %v2740_v54 }
  0x1c   : > { %2475 = vmatmul.mubr.msk.bf16.vlgmr.msra.gmra.mxu1 %vm329_vm1, %v303_v23  ;;  %v299_v39 = vpack.c.bf16 %v273_v34, %v272_v33  ;;  %v300_v40 = vpack.c.bf16 %v275_v37, %v274_v36  ;;  %v288_v41 = vld [vmem:[%s2977_s9 + $0xd0] sm:$0xff]  ;;  %v289_v42 = vld [vmem:[%s2977_s9 + $0xd8] sm:$0xff]  ;;  %v290_v43 = vld [vmem:[%s2977_s9 + $0xe0] sm:$0xff] }
  0x1d   : > { %2478 = vmatprep.mubr.msk.bf16.mxu1 %vm329_vm1, %v304_v27  ;;  %2491 = vmatpush3.bf16.msra.mxu1 %v2737_v3  ;;  %v291_v44 = vld [vmem:[%s2977_s9 + $0xe8] sm:$0xff]  ;;  %v276_v45 = vld [vmem:[%s2977_s9 + $0x70] sm:$0xff]  ;;  %v277_v46 = vld [vmem:[%s2977_s9 + $0x78] sm:$0xff]  ;;  %v307_v47 = vpack.c.bf16 %v289_v42, %v288_v41 }
  0x1e   : > { %2492 = vmatprep.subr.bf16.mxu1 %v2738_v25  ;;  %v308_v48 = vpack.c.bf16 %v291_v44, %v290_v43  ;;  %v301_v49 = vpack.c.bf16 %v277_v46, %v276_v45  ;;  %v292_v50 = vld [vmem:[%s2977_s9 + $0xf0] sm:$0xff]  ;;  %v293_v51 = vld [vmem:[%s2977_s9 + $0xf8] sm:$0xff]  ;;  %2529 = vmatpush3.bf16.msra.mxu0 %v2740_v54  ;;  %s2238_s9 = sshll.u32 %s225_s5, 8 }
  0x1f   : > { %v309_v52 = vpack.c.bf16 %v293_v51, %v292_v50  ;;  %s3363_s10 = scalar_lea.vmem [#allocation2], %s2238_s9  }
  0x21   : > { %2463 = vmatmul.mubr.msk.bf16.gmra.mxu0 %vm329_vm1, %v297_v26  ;;  %2493 = vmatpush3.bf16.msra.mxu1 %v2738_v25 }
  0x22   : > { %2466 = vmatprep.mubr.msk.bf16.mxu0 %vm329_vm1, %v298_v28 }
  0x24   : > { %2479 = vmatmul.mubr.msk.bf16.gmra.mxu1 %vm329_vm1, %v305_v35 }
  0x25   : > { %2482 = vmatprep.mubr.msk.bf16.mxu1 %vm329_vm1, %v306_v38 }
  0x29   : > { %2467 = vmatmul.mubr.msk.bf16.gmra.mxu0 %vm329_vm1, %v299_v39 }
  0x2a   : > { %2470 = vmatprep.mubr.msk.bf16.mxu0 %vm329_vm1, %v300_v40 }
  0x2c   : > { %2483 = vmatmul.mubr.msk.bf16.gmra.mxu1 %vm329_vm1, %v307_v47 }
  0x2d   : > { %2486 = vmatprep.mubr.msk.bf16.mxu1 %vm329_vm1, %v308_v48 }
  0x31   : > { %2471 = vmatmul.mubr.msk.bf16.gmra.mxu0 %vm329_vm1, %v301_v49 }
  0x34   : > { %2487 = vmatmul.mubr.msk.bf16.gmra.mxu1 %vm329_vm1, %v309_v52 }
  0xd9   : > { %v2460_v55 = vpop.f32.mrf.mxu0 }
  0xda   : > { %v425_v62 = vadd.f32 %v2460_v55, %v3039_v57 }
  0xdb   : > { %v416_v56 = vpop.f32.mrf.mxu0 }
  0xdc   : > { %v417_v59 = vadd.f32 %v3039_v57, %v416_v56  ;;  %v3043_v61 = vpop.f32.mrf.mxu1  ;;  %v545_v7 = vmax.f32 %v425_v62, 0.0 }
  0xdd   : > { %v2461_v58 = vpop.f32.mrf.mxu0 }
  0xde   : > { %v428_v60 = vadd.f32 %v2461_v58, %v3039_v57  ;;  %v480_v1 = vpop.f32.mrf.mxu1  ;;  %v543_v4 = vmax.f32 %v417_v59, 0.0 }
  0xdf   : > { %v419_v63 = vpop.f32.mrf.mxu0  ;;  %v481_v45 = vadd.f32 %v3039_v57, %v480_v1 }
  0xe0   : > { %v420_v0 = vadd.f32 %v3039_v57, %v419_v63  ;;  %v546_v2 = vmax.f32 %v428_v60, 0.0  ;;  %v3047_v6 = vpop.f32.mrf.mxu1 }
  0xe1   : > { %v2464_v3 = vpop.f32.mrf.mxu0  ;;  %v559_v55 = vmax.f32 %v481_v45, 0.0 }
  0xe2   : > { %v544_v5 = vmax.f32 %v420_v0, 0.0  ;;  %v483_v10 = vpop.f32.mrf.mxu1  ;;  %v576_v11 = vpack.c.bf16 %v546_v2, %v545_v7  ;;  %v441_v16 = vadd.f32 %v2464_v3, %v3039_v57  ;;  %v492_v7 = vadd.f32 %v3047_v6, %v3039_v57 }
  0xe3   : > { %v432_v8 = vpop.f32.mrf.mxu0  ;;  %v484_v46 = vadd.f32 %v3039_v57, %v483_v10 }
  0xe4   : > { %v575_v9 = vpack.c.bf16 %v544_v5, %v543_v4  ;;  %v433_v13 = vadd.f32 %v3039_v57, %v432_v8  ;;  %v3052_v15 = vpop.f32.mrf.mxu1  ;;  %v549_v25 = vmax.f32 %v441_v16, 0.0  ;;  %v489_v5 = vadd.f32 %v3043_v61, %v3039_v57 }
  0xe5   : > { %v2465_v12 = vpop.f32.mrf.mxu0  ;;  %v560_v56 = vmax.f32 %v484_v46, 0.0  ;;  %v505_v6 = vadd.f32 %v3052_v15, %v3039_v57 }
  0xe6   : > { %v444_v14 = vadd.f32 %v2465_v12, %v3039_v57  ;;  %2494 = vmatprep.mubr.msk.bf16.mxu1 %vm614_vm2, %v575_v9  ;;  %v496_v19 = vpop.f32.mrf.mxu1  ;;  %v547_v22 = vmax.f32 %v433_v13, 0.0  ;;  %v562_v12 = vmax.f32 %v492_v7, 0.0 }
  0xe7   : > { %v435_v17 = vpop.f32.mrf.mxu0  ;;  %2495 = vmatmul.mubr.msk.bf16.vlgmr.msra.gmra.mxu1 %vm614_vm2, %v576_v11  ;;  %v583_v1 = vpack.c.bf16 %v560_v56, %v559_v55  ;;  %v497_v2 = vadd.f32 %v3039_v57, %v496_v19  ;;  %v561_v11 = vmax.f32 %v489_v5, 0.0 }
  0xe8   : > { %v436_v18 = vadd.f32 %v3039_v57, %v435_v17  ;;  %v550_v20 = vmax.f32 %v444_v14, 0.0  ;;  %v3057_v24 = vpop.f32.mrf.mxu1 }
  0xe9   : > { %v2468_v21 = vpop.f32.mrf.mxu0  ;;  %v563_v9 = vmax.f32 %v497_v2, 0.0  ;;  %v584_v17 = vpack.c.bf16 %v562_v12, %v561_v11 }
  0xea   : > { %v548_v23 = vmax.f32 %v436_v18, 0.0  ;;  %v499_v28 = vpop.f32.mrf.mxu1  ;;  %v578_v29 = vpack.c.bf16 %v550_v20, %v549_v25  ;;  %v457_v30 = vadd.f32 %v2468_v21, %v3039_v57  ;;  %v508_v18 = vadd.f32 %v3057_v24, %v3039_v57 }
  0xeb   : > { %v448_v26 = vpop.f32.mrf.mxu0  ;;  %v500_v3 = vadd.f32 %v3039_v57, %v499_v28 }
  0xec   : > { %v577_v27 = vpack.c.bf16 %v548_v23, %v547_v22  ;;  %v449_v32 = vadd.f32 %v3039_v57, %v448_v26  ;;  %v3063_v34 = vpop.f32.mrf.mxu1  ;;  %v553_v37 = vmax.f32 %v457_v30, 0.0  ;;  %v565_v22 = vmax.f32 %v505_v6, 0.0 }
  0xed   : > { %v2469_v31 = vpop.f32.mrf.mxu0  ;;  %v564_v10 = vmax.f32 %v500_v3, 0.0  ;;  %v566_v23 = vmax.f32 %v508_v18, 0.0  ;;  %v521_v15 = vadd.f32 %v3063_v34, %v3039_v57 }
  0xee   : > { %v460_v33 = vadd.f32 %v2469_v31, %v3039_v57  ;;  %2498 = vmatprep.mubr.msk.bf16.mxu1 %vm614_vm2, %v577_v27  ;;  %v512_v40 = vpop.f32.mrf.mxu1  ;;  %v551_v41 = vmax.f32 %v449_v32, 0.0 }
  0xef   : > { %v451_v35 = vpop.f32.mrf.mxu0  ;;  %2499 = vmatmul.mubr.msk.bf16.gmra.mxu1 %vm614_vm2, %v578_v29  ;;  %v585_v14 = vpack.c.bf16 %v564_v10, %v563_v9  ;;  %v513_v16 = vadd.f32 %v3039_v57, %v512_v40  ;;  %v586_v29 = vpack.c.bf16 %v566_v23, %v565_v22  ;;  %v569_v32 = vmax.f32 %v521_v15, 0.0 }
  0xf0   : > { %v452_v36 = vadd.f32 %v3039_v57, %v451_v35  ;;  %v554_v38 = vmax.f32 %v460_v33, 0.0  ;;  %v2485_v50 = vpop.f32.mrf.mxu1 }
  0xf1   : > { %v2472_v39 = vpop.f32.mrf.mxu0  ;;  %v567_v20 = vmax.f32 %v513_v16, 0.0  ;;  %v524_v24 = vadd.f32 %v2485_v50, %v3039_v57 }
  0xf2   : > { %v552_v42 = vmax.f32 %v452_v36, 0.0  ;;  %v580_v47 = vpack.c.bf16 %v554_v38, %v553_v37  ;;  %v473_v48 = vadd.f32 %v2472_v39, %v3039_v57  ;;  %v515_v60 = vpop.f32.mrf.mxu1 }
  0xf3   : > { %v464_v43 = vpop.f32.mrf.mxu0  ;;  %v516_v61 = vadd.f32 %v3039_v57, %v515_v60  ;;  %v570_v33 = vmax.f32 %v524_v24, 0.0 }
  0xf4   : > { %v579_v44 = vpack.c.bf16 %v552_v42, %v551_v41  ;;  %v465_v51 = vadd.f32 %v3039_v57, %v464_v43  ;;  %v557_v58 = vmax.f32 %v473_v48, 0.0  ;;  %v2488_v8 = vpop.f32.mrf.mxu1  ;;  %v3107_v43 = vld [vmem:[%s3600_s2 + $0x1] ss:$0 sm:$0xff] }
  0xf5   : > { %v2473_v49 = vpop.f32.mrf.mxu0  ;;  %v568_v21 = vmax.f32 %v516_v61, 0.0  ;;  %v588_v36 = vpack.c.bf16 %v570_v33, %v569_v32  ;;  %v537_v37 = vadd.f32 %v2488_v8, %v3039_v57 }
  0xf6   : > { %v476_v52 = vadd.f32 %v2473_v49, %v3039_v57  ;;  %2502 = vmatprep.mubr.msk.bf16.mxu1 %vm614_vm2, %v579_v44  ;;  %v555_v62 = vmax.f32 %v465_v51, 0.0  ;;  %v528_v13 = vpop.f32.mrf.mxu1 }
  0xf7   : > { %v467_v53 = vpop.f32.mrf.mxu0  ;;  %2503 = vmatmul.mubr.msk.bf16.gmra.mxu1 %vm614_vm2, %v580_v47  ;;  %v587_v26 = vpack.c.bf16 %v568_v21, %v567_v20  ;;  %v529_v27 = vadd.f32 %v3039_v57, %v528_v13  ;;  %v573_v34 = vmax.f32 %v537_v37, 0.0 }
  0xf8   : > { %v468_v54 = vadd.f32 %v3039_v57, %v467_v53  ;;  %v558_v59 = vmax.f32 %v476_v52, 0.0  ;;  %v2489_v19 = vpop.f32.mrf.mxu1 }
  0xf9   : > { %v571_v30 = vmax.f32 %v529_v27, 0.0  ;;  %v540_v38 = vadd.f32 %v2489_v19, %v3039_v57 }
  0xfa   : > { %v556_v63 = vmax.f32 %v468_v54, 0.0  ;;  %v582_v4 = vpack.c.bf16 %v558_v59, %v557_v58  ;;  %v531_v25 = vpop.f32.mrf.mxu1 }
  0xfb   : > { %v532_v28 = vadd.f32 %v3039_v57, %v531_v25  ;;  %v574_v39 = vmax.f32 %v540_v38, 0.0 }
  0xfc   : > { %v581_v0 = vpack.c.bf16 %v556_v63, %v555_v62 }
  0xfd   : > { %v572_v31 = vmax.f32 %v532_v28, 0.0  ;;  %v590_v40 = vpack.c.bf16 %v574_v39, %v573_v34 }
  0xfe   : > { %2506 = vmatprep.mubr.msk.bf16.mxu1 %vm614_vm2, %v581_v0 }
  0xff   : > { %2507 = vmatmul.mubr.msk.bf16.gmra.mxu1 %vm614_vm2, %v582_v4  ;;  %v589_v35 = vpack.c.bf16 %v572_v31, %v571_v30 }
 0x100   : > { %2510 = vmatprep.mubr.msk.bf16.mxu1 %vm614_vm2, %v583_v1 }
 0x107   : > { %2511 = vmatmul.mubr.msk.bf16.gmra.mxu1 %vm614_vm2, %v584_v17 }
 0x108   : > { %2514 = vmatprep.mubr.msk.bf16.mxu1 %vm614_vm2, %v585_v14 }
 0x10f   : > { %2515 = vmatmul.mubr.msk.bf16.gmra.mxu1 %vm614_vm2, %v586_v29 }
 0x110   : > { %2518 = vmatprep.mubr.msk.bf16.mxu1 %vm614_vm2, %v587_v26 }
 0x117   : > { %2519 = vmatmul.mubr.msk.bf16.gmra.mxu1 %vm614_vm2, %v588_v36 }
 0x118   : > { %2522 = vmatprep.mubr.msk.bf16.mxu1 %vm614_vm2, %v589_v35 }
 0x11f   : > { %2523 = vmatmul.mubr.msk.bf16.gmra.mxu1 %vm614_vm2, %v590_v40 }
 0x1a7   : > { %v2496_v41 = vpop.f32.mrf.mxu1 }
 0x1a8   : > { %v706_v46 = vadd.f32 %v2496_v41, %v3107_v43 }
 0x1a9   : > { %v697_v42 = vpop.f32.mrf.mxu1 }
 0x1aa   : > { %v698_v45 = vadd.f32 %v3107_v43, %v697_v42  ;;  %v826_v53 = vmax.f32 %v706_v46, 0.0 }
 0x1ab   : > { %v2497_v44 = vpop.f32.mrf.mxu1 }
 0x1ac   : > { %v709_v57 = vadd.f32 %v2497_v44, %v3107_v43  ;;  %v824_v51 = vmax.f32 %v698_v45, 0.0 }
 0x1ad   : > { %v700_v47 = vpop.f32.mrf.mxu1 }
 0x1ae   : > { %v701_v48 = vadd.f32 %v3107_v43, %v700_v47  ;;  %v827_v49 = vmax.f32 %v709_v57, 0.0 }
 0x1af   : > { %v2500_v50 = vpop.f32.mrf.mxu1 }
 0x1b0   : > { %v825_v52 = vmax.f32 %v701_v48, 0.0  ;;  %v857_v56 = vpack.c.bf16 %v827_v49, %v826_v53  ;;  %v722_v62 = vadd.f32 %v2500_v50, %v3107_v43 }
 0x1b1   : > { %v713_v54 = vpop.f32.mrf.mxu1 }
 0x1b2   : > { %v856_v55 = vpack.c.bf16 %v825_v52, %v824_v51  ;;  %v714_v59 = vadd.f32 %v3107_v43, %v713_v54  ;;  %v830_v5 = vmax.f32 %v722_v62, 0.0 }
 0x1b3   : > { %v2501_v58 = vpop.f32.mrf.mxu1 }
 0x1b4   : > { %v725_v60 = vadd.f32 %v2501_v58, %v3107_v43  ;;  %2530 = vmatprep.mubr.msk.bf16.mxu0 %vm614_vm2, %v856_v55  ;;  %v828_v3 = vmax.f32 %v714_v59, 0.0 }
 0x1b5   : > { %v716_v63 = vpop.f32.mrf.mxu1  ;;  %2531 = vmatmul.mubr.msk.bf16.vlgmr.msra.gmra.mxu0 %vm614_vm2, %v857_v56 }
 0x1b6   : > { %v717_v0 = vadd.f32 %v3107_v43, %v716_v63  ;;  %v831_v1 = vmax.f32 %v725_v60, 0.0 }
 0x1b7   : > { %v2504_v2 = vpop.f32.mrf.mxu1 }
 0x1b8   : > { %v829_v4 = vmax.f32 %v717_v0, 0.0  ;;  %v859_v9 = vpack.c.bf16 %v831_v1, %v830_v5  ;;  %v738_v13 = vadd.f32 %v2504_v2, %v3107_v43 }
 0x1b9   : > { %v729_v7 = vpop.f32.mrf.mxu1 }
 0x1ba   : > { %v858_v8 = vpack.c.bf16 %v829_v4, %v828_v3  ;;  %v730_v11 = vadd.f32 %v3107_v43, %v729_v7  ;;  %v834_v19 = vmax.f32 %v738_v13, 0.0 }
 0x1bb   : > { %v2505_v10 = vpop.f32.mrf.mxu1 }
 0x1bc   : > { %v741_v12 = vadd.f32 %v2505_v10, %v3107_v43  ;;  %2534 = vmatprep.mubr.msk.bf16.mxu0 %vm614_vm2, %v858_v8  ;;  %v832_v6 = vmax.f32 %v730_v11, 0.0 }
 0x1bd   : > { %v732_v14 = vpop.f32.mrf.mxu1  ;;  %2535 = vmatmul.mubr.msk.bf16.gmra.mxu0 %vm614_vm2, %v859_v9 }
 0x1be   : > { %v733_v16 = vadd.f32 %v3107_v43, %v732_v14  ;;  %v835_v61 = vmax.f32 %v741_v12, 0.0 }
 0x1bf   : > { %v2508_v17 = vpop.f32.mrf.mxu1 }
 0x1c0   : > { %v833_v18 = vmax.f32 %v733_v16, 0.0  ;;  %v861_v22 = vpack.c.bf16 %v835_v61, %v834_v19  ;;  %v754_v27 = vadd.f32 %v2508_v17, %v3107_v43 }
 0x1c1   : > { %v745_v20 = vpop.f32.mrf.mxu1 }
 0x1c2   : > { %v860_v21 = vpack.c.bf16 %v833_v18, %v832_v6  ;;  %v746_v25 = vadd.f32 %v3107_v43, %v745_v20  ;;  %v838_v32 = vmax.f32 %v754_v27, 0.0 }
 0x1c3   : > { %v2509_v23 = vpop.f32.mrf.mxu1 }
 0x1c4   : > { %v757_v26 = vadd.f32 %v2509_v23, %v3107_v43  ;;  %2538 = vmatprep.mubr.msk.bf16.mxu0 %vm614_vm2, %v860_v21  ;;  %v836_v30 = vmax.f32 %v746_v25, 0.0 }
 0x1c5   : > { %v748_v28 = vpop.f32.mrf.mxu1  ;;  %2539 = vmatmul.mubr.msk.bf16.gmra.mxu0 %vm614_vm2, %v861_v22 }
 0x1c6   : > { %v749_v29 = vadd.f32 %v3107_v43, %v748_v28  ;;  %v839_v15 = vmax.f32 %v757_v26, 0.0 }
 0x1c7   : > { %v2512_v24 = vpop.f32.mrf.mxu1 }
 0x1c8   : > { %v837_v31 = vmax.f32 %v749_v29, 0.0  ;;  %v863_v36 = vpack.c.bf16 %v839_v15, %v838_v32  ;;  %v770_v39 = vadd.f32 %v2512_v24, %v3107_v43  ;;  %v2741_v29 = vld [vmem:[%s3601_s3 + $0x40] sm:$0xff]   ;;  %v2742_v15 = vld [vmem:[%s3601_s3 + $0x38] sm:$0xff]  }
 0x1c9   : > { %v761_v33 = vpop.f32.mrf.mxu1  ;;  %2562 = vmatprep.subr.bf16.mxu1 %v2741_v29 }
 0x1ca   : > { %v862_v35 = vpack.c.bf16 %v837_v31, %v836_v30  ;;  %v762_v38 = vadd.f32 %v3107_v43, %v761_v33  ;;  %v842_v46 = vmax.f32 %v770_v39, 0.0  ;;  %2563 = vmatpush3.bf16.msra.mxu1 %v2741_v29  ;;  %v3169_v31 = vld [vmem:[%s3600_s2 + $0x2] ss:$0 sm:$0xff] }
 0x1cb   : > { %v2513_v37 = vpop.f32.mrf.mxu1  ;;  %2564 = vmatprep.subr.bf16.mxu1 %v2742_v15 }
 0x1cc   : > { %v773_v34 = vadd.f32 %v2513_v37, %v3107_v43  ;;  %2542 = vmatprep.mubr.msk.bf16.mxu0 %vm614_vm2, %v862_v35  ;;  %v840_v45 = vmax.f32 %v762_v38, 0.0 }
 0x1cd   : > { %v764_v40 = vpop.f32.mrf.mxu1  ;;  %2543 = vmatmul.mubr.msk.bf16.gmra.mxu0 %vm614_vm2, %v863_v36 }
 0x1ce   : > { %v765_v41 = vadd.f32 %v3107_v43, %v764_v40  ;;  %v843_v42 = vmax.f32 %v773_v34, 0.0  ;;  %2565 = vmatpush3.bf16.msra.mxu1 %v2742_v15 }
 0x1cf   : > { %v2516_v44 = vpop.f32.mrf.mxu1 }
 0x1d0   : > { %v841_v57 = vmax.f32 %v765_v41, 0.0  ;;  %v865_v49 = vpack.c.bf16 %v843_v42, %v842_v46  ;;  %v786_v53 = vadd.f32 %v2516_v44, %v3107_v43 }
 0x1d1   : > { %v777_v47 = vpop.f32.mrf.mxu1 }
 0x1d2   : > { %v864_v48 = vpack.c.bf16 %v841_v57, %v840_v45  ;;  %v778_v51 = vadd.f32 %v3107_v43, %v777_v47  ;;  %v846_v62 = vmax.f32 %v786_v53, 0.0 }
 0x1d3   : > { %v2517_v50 = vpop.f32.mrf.mxu1 }
 0x1d4   : > { %v789_v52 = vadd.f32 %v2517_v50, %v3107_v43  ;;  %2546 = vmatprep.mubr.msk.bf16.mxu0 %vm614_vm2, %v864_v48  ;;  %v844_v59 = vmax.f32 %v778_v51, 0.0 }
 0x1d5   : > { %v780_v54 = vpop.f32.mrf.mxu1  ;;  %2547 = vmatmul.mubr.msk.bf16.gmra.mxu0 %vm614_vm2, %v865_v49 }
 0x1d6   : > { %v781_v55 = vadd.f32 %v3107_v43, %v780_v54  ;;  %v847_v56 = vmax.f32 %v789_v52, 0.0 }
 0x1d7   : > { %v2520_v58 = vpop.f32.mrf.mxu1 }
 0x1d8   : > { %v845_v60 = vmax.f32 %v781_v55, 0.0  ;;  %v867_v1 = vpack.c.bf16 %v847_v56, %v846_v62  ;;  %v802_v5 = vadd.f32 %v2520_v58, %v3107_v43 }
 0x1d9   : > { %v793_v63 = vpop.f32.mrf.mxu1 }
 0x1da   : > { %v866_v0 = vpack.c.bf16 %v845_v60, %v844_v59  ;;  %v794_v3 = vadd.f32 %v3107_v43, %v793_v63  ;;  %v850_v13 = vmax.f32 %v802_v5, 0.0 }
 0x1db   : > { %v2521_v2 = vpop.f32.mrf.mxu1 }
 0x1dc   : > { %v805_v4 = vadd.f32 %v2521_v2, %v3107_v43  ;;  %2550 = vmatprep.mubr.msk.bf16.mxu0 %vm614_vm2, %v866_v0  ;;  %v848_v11 = vmax.f32 %v794_v3, 0.0 }
 0x1dd   : > { %v796_v7 = vpop.f32.mrf.mxu1  ;;  %2551 = vmatmul.mubr.msk.bf16.gmra.mxu0 %vm614_vm2, %v867_v1 }
 0x1de   : > { %v797_v8 = vadd.f32 %v3107_v43, %v796_v7  ;;  %v851_v9 = vmax.f32 %v805_v4, 0.0 }
 0x1df   : > { %v2524_v10 = vpop.f32.mrf.mxu1 }
 0x1e0   : > { %v849_v12 = vmax.f32 %v797_v8, 0.0  ;;  %v869_v61 = vpack.c.bf16 %v851_v9, %v850_v13  ;;  %v818_v19 = vadd.f32 %v2524_v10, %v3107_v43 }
 0x1e1   : > { %v809_v14 = vpop.f32.mrf.mxu1 }
 0x1e2   : > { %v868_v16 = vpack.c.bf16 %v849_v12, %v848_v11  ;;  %v810_v6 = vadd.f32 %v3107_v43, %v809_v14  ;;  %v854_v26 = vmax.f32 %v818_v19, 0.0 }
 0x1e3   : > { %v2525_v17 = vpop.f32.mrf.mxu1 }
 0x1e4   : > { %v821_v18 = vadd.f32 %v2525_v17, %v3107_v43  ;;  %2554 = vmatprep.mubr.msk.bf16.mxu0 %vm614_vm2, %v868_v16  ;;  %v852_v23 = vmax.f32 %v810_v6, 0.0 }
 0x1e5   : > { %v812_v20 = vpop.f32.mrf.mxu1  ;;  %2555 = vmatmul.mubr.msk.bf16.gmra.mxu0 %vm614_vm2, %v869_v61 }
 0x1e6   : > { %v813_v21 = vadd.f32 %v3107_v43, %v812_v20  ;;  %v855_v22 = vmax.f32 %v821_v18, 0.0  ;;  %v2743_v43 = vld [vmem:[%s3601_s3 + $0x30] sm:$0xff]  }
 0x1e7   : > { %2566 = vmatprep.subr.bf16.mxu1 %v2743_v43 }
 0x1e8   : > { %v853_v25 = vmax.f32 %v813_v21, 0.0  ;;  %v871_v28 = vpack.c.bf16 %v855_v22, %v854_v26  ;;  %2567 = vmatpush3.bf16.msra.mxu1 %v2743_v43 }
 0x1ea   : > { %v870_v27 = vpack.c.bf16 %v853_v25, %v852_v23 }
 0x1ec   : > { %2558 = vmatprep.mubr.msk.bf16.mxu0 %vm614_vm2, %v870_v27 }
 0x1ed   : > { %2559 = vmatmul.mubr.msk.bf16.gmra.mxu0 %vm614_vm2, %v871_v28 }
 0x275   : > { %v2532_v24 = vpop.f32.mrf.mxu0 }
 0x276   : > { %v986_v34 = vadd.f32 %v2532_v24, %v3169_v31 }
 0x277   : > { %v977_v30 = vpop.f32.mrf.mxu0 }
 0x278   : > { %v978_v32 = vadd.f32 %v3169_v31, %v977_v30 }
 0x279   : > { %v2533_v33 = vpop.f32.mrf.mxu0 }
 0x27a   : > { %v989_v36 = vadd.f32 %v2533_v33, %v3169_v31  ;;  %2748 = vtanh.f32 %v978_v32 }
 0x27b   : > { %v980_v35 = vpop.f32.mrf.mxu0 }
 0x27c   : > { %v981_v37 = vadd.f32 %v3169_v31, %v980_v35 }
 0x27d   : > { %v2536_v38 = vpop.f32.mrf.mxu0 }
 0x27e   : > { %2750 = vtanh.f32 %v981_v37  ;;  %v1002_v46 = vadd.f32 %v2536_v38, %v3169_v31 }
 0x27f   : > { %v993_v39 = vpop.f32.mrf.mxu0  ;;  %2752 = vtanh.f32 %v989_v36 }
 0x280   : > { %v994_v40 = vadd.f32 %v3169_v31, %v993_v39  ;;  %2754 = vtanh.f32 %v986_v34 }
 0x281   : > { %v2537_v41 = vpop.f32.mrf.mxu0 }
 0x282   : > { %v1005_v44 = vadd.f32 %v2537_v41, %v3169_v31  ;;  %2756 = vtanh.f32 %v994_v40 }
 0x283   : > { %v996_v42 = vpop.f32.mrf.mxu0 }
 0x284   : > { %v997_v45 = vadd.f32 %v3169_v31, %v996_v42 }
 0x285   : > { %v2540_v57 = vpop.f32.mrf.mxu0 }
 0x286   : > { %2758 = vtanh.f32 %v997_v45  ;;  %v1018_v47 = vadd.f32 %v2540_v57, %v3169_v31 }
 0x287   : > { %v1009_v48 = vpop.f32.mrf.mxu0  ;;  %2760 = vtanh.f32 %v1005_v44  ;;  %v2749_v51 = vpop.eup %2748 }
 0x288   : > { %v1010_v49 = vadd.f32 %v3169_v31, %v1009_v48  ;;  %2762 = vtanh.f32 %v1002_v46 }
 0x289   : > { %v2541_v50 = vpop.f32.mrf.mxu0  ;;  %2764 = vtanh.f32 %v1018_v47 }
 0x28a   : > { %v1021_v52 = vadd.f32 %v2541_v50, %v3169_v31 }
 0x28b   : > { %v2751_v53 = vpop.eup %2750  ;;  %v1012_v54 = vpop.f32.mrf.mxu0 }
 0x28c   : > { %2766 = vtanh.f32 %v1021_v52  ;;  %v1013_v55 = vadd.f32 %v3169_v31, %v1012_v54  ;;  %v1136_v56 = vpack.c.bf16 %v2751_v53, %v2749_v51  ;;  %v2753_v58 = vpop.eup %2752 }
 0x28d   : > { %2768 = vtanh.f32 %v1010_v49  ;;  %v2544_v59 = vpop.f32.mrf.mxu0  ;;  %v2755_v60 = vpop.eup %2754 }
 0x28e   : > { %2770 = vtanh.f32 %v1013_v55  ;;  %1216 = vrot.lane.b32.xlu0 %v1136_v56, %s2900_s11  ;;  %v1034_v62 = vadd.f32 %v2544_v59, %v3169_v31  ;;  %v1137_v0 = vpack.c.bf16 %v2753_v58, %v2755_v60 }
 0x28f   : > { %v1025_v63 = vpop.f32.mrf.mxu0  ;;  %v2757_v3 = vpop.eup %2756 }
 0x290   : > { %v1026_v1 = vadd.f32 %v3169_v31, %v1025_v63  ;;  %2772 = vtanh.f32 %v1034_v62 }
 0x291   : > { %v2545_v2 = vpop.f32.mrf.mxu0 }
 0x292   : > { %v1037_v4 = vadd.f32 %v2545_v2, %v3169_v31  ;;  %1218 = vrot.lane.b32.xlu0 %v1137_v0, %s2900_s11 }
 0x293   : > { %v2759_v5 = vpop.eup %2758  ;;  %v1028_v7 = vpop.f32.mrf.mxu0 }
 0x294   : > { %2774 = vtanh.f32 %v1037_v4  ;;  %v1029_v8 = vadd.f32 %v3169_v31, %v1028_v7  ;;  %v1138_v9 = vpack.c.bf16 %v2759_v5, %v2757_v3  ;;  %v2761_v10 = vpop.eup %2760 }
 0x295   : > { %2776 = vtanh.f32 %v1026_v1  ;;  %v2548_v11 = vpop.f32.mrf.mxu0  ;;  %v2763_v12 = vpop.eup %2762 }
 0x296   : > { %2778 = vtanh.f32 %v1029_v8  ;;  %1220 = vrot.lane.b32.xlu1 %v1138_v9, %s2900_s11  ;;  %v1050_v13 = vadd.f32 %v2548_v11, %v3169_v31  ;;  %v2765_v16 = vpop.eup %2764  ;;  %v1139_v61 = vpack.c.bf16 %v2761_v10, %v2763_v12  ;;  %v2745_v12 = vld [vmem:[%s3601_s3 + $0x58] sm:$0xff]  }
 0x297   : > { %v1041_v14 = vpop.f32.mrf.mxu0 }
 0x298   : > { %v1042_v6 = vadd.f32 %v3169_v31, %v1041_v14  ;;  %2780 = vtanh.f32 %v1050_v13 }
 0x299   : > { %v2767_v17 = vpop.eup %2766  ;;  %v2549_v18 = vpop.f32.mrf.mxu0 }
 0x29a   : > { %v2769_v19 = vpop.eup %2768  ;;  %v1053_v20 = vadd.f32 %v2549_v18, %v3169_v31  ;;  %1222 = vrot.lane.b32.xlu1 %v1139_v61, %s2900_s11  ;;  %v1141_v25 = vpack.c.bf16 %v2767_v17, %v2765_v16  ;;  %v2746_v17 = vld [vmem:[%s3601_s3 + $0x50] sm:$0xff]  }
 0x29b   : > { %v2771_v21 = vpop.eup %2770  ;;  %v1044_v22 = vpop.f32.mrf.mxu0 }
 0x29c   : > { %2782 = vtanh.f32 %v1053_v20  ;;  %v1045_v23 = vadd.f32 %v3169_v31, %v1044_v22  ;;  %v1140_v26 = vpack.c.bf16 %v2771_v21, %v2769_v19  ;;  %v2747_v19 = vld [vmem:[%s3601_s3 + $0x48] sm:$0xff]   ;;  %v1152_v20 = vld [vmem:[%s3236_s30] sm:$0xff] }
 0x29d   : > { %2784 = vtanh.f32 %v1042_v6  ;;  %v2552_v27 = vpop.f32.mrf.mxu0  ;;  %v2773_v15 = vpop.eup %2772  ;;  %v1153_v21 = vld [vmem:[%s3236_s30 + $0x8] sm:$0xff] }
 0x29e   : > { %2786 = vtanh.f32 %v1045_v23  ;;  %1226 = vrot.lane.b32.xlu1 %v1141_v25, %s2900_s11  ;;  %1224 = vrot.lane.b32.xlu0 %v1140_v26, %s2900_s11  ;;  %v1066_v28 = vadd.f32 %v2552_v27, %v3169_v31  ;;  %v1184_v22 = vpack.c.bf16 %v1153_v21, %v1152_v20  ;;  %v1154_v23 = vld [vmem:[%s3236_s30 + $0x10] sm:$0xff]  ;;  %v1155_v25 = vld [vmem:[%s3236_s30 + $0x18] sm:$0xff] }
 0x29f   : > { %v1057_v29 = vpop.f32.mrf.mxu0  ;;  %v1179_v20 = vld [vmem:[%s3236_s30 + $0xd8] sm:$0xff] }
 0x2a0   : > { %v1058_v24 = vadd.f32 %v3169_v31, %v1057_v29  ;;  %2788 = vtanh.f32 %v1066_v28  ;;  %v1185_v28 = vpack.c.bf16 %v1155_v25, %v1154_v23  ;;  %v1156_v29 = vld [vmem:[%s3236_s30 + $0x20] sm:$0xff] }
 0x2a1   : > { %v2775_v43 = vpop.eup %2774  ;;  %v2553_v30 = vpop.f32.mrf.mxu0 }
 0x2a2   : > { %v2777_v32 = vpop.eup %2776  ;;  %v1069_v33 = vadd.f32 %v2553_v30, %v3169_v31  ;;  %v1143_v35 = vpack.c.bf16 %v2775_v43, %v2773_v15  ;;  %v1157_v15 = vld [vmem:[%s3236_s30 + $0x28] sm:$0xff] }
 0x2a3   : > { %v2779_v36 = vpop.eup %2778  ;;  %v1060_v37 = vpop.f32.mrf.mxu0  ;;  %v1186_v30 = vpack.c.bf16 %v1157_v15, %v1156_v29  ;;  %v1182_v15 = vld [vmem:[%s3236_s30 + $0xf0] sm:$0xff] }
 0x2a4   : > { %2790 = vtanh.f32 %v1069_v33  ;;  %v1061_v38 = vadd.f32 %v3169_v31, %v1060_v37  ;;  %1230 = vrot.lane.b32.xlu1 %v1143_v35, %s2900_s11  ;;  %v1142_v34 = vpack.c.bf16 %v2779_v36, %v2777_v32  ;;  %v1158_v32 = vld [vmem:[%s3236_s30 + $0x30] sm:$0xff]  ;;  %v1159_v33 = vld [vmem:[%s3236_s30 + $0x38] sm:$0xff] }
 0x2a5   : > { %2792 = vtanh.f32 %v1058_v24  ;;  %v2556_v39 = vpop.f32.mrf.mxu0  ;;  %v2781_v42 = vpop.eup %2780  ;;  %v1187_v37 = vpack.c.bf16 %v1159_v33, %v1158_v32 }
 0x2a6   : > { %2794 = vtanh.f32 %v1061_v38  ;;  %1228 = vrot.lane.b32.xlu0 %v1142_v34, %s2900_s11  ;;  %v1082_v40 = vadd.f32 %v2556_v39, %v3169_v31  ;;  %v1160_v38 = vld [vmem:[%s3236_s30 + $0x40] sm:$0xff]  ;;  %v1161_v34 = vld [vmem:[%s3236_s30 + $0x48] sm:$0xff] }
 0x2a7   : > { %v1073_v41 = vpop.f32.mrf.mxu0 }
 0x2a8   : > { %v1074_v45 = vadd.f32 %v3169_v31, %v1073_v41  ;;  %2796 = vtanh.f32 %v1082_v40  ;;  %v1188_v41 = vpack.c.bf16 %v1161_v34, %v1160_v38  ;;  %v3305_v38 = vld [vmem:[%s3600_s2 + $0x3] ss:$0 sm:$0xff] }
 0x2a9   : > { %v2783_v44 = vpop.eup %2782  ;;  %v2557_v57 = vpop.f32.mrf.mxu0 }
 0x2aa   : > { %v2785_v46 = vpop.eup %2784  ;;  %v1085_v47 = vadd.f32 %v2557_v57, %v3169_v31  ;;  %v1145_v48 = vpack.c.bf16 %v2783_v44, %v2781_v42  ;;  %v1162_v42 = vld [vmem:[%s3236_s30 + $0x50] sm:$0xff]  ;;  %v1163_v44 = vld [vmem:[%s3236_s30 + $0x58] sm:$0xff] }
 0x2ab   : > { %v2787_v49 = vpop.eup %2786  ;;  %v1076_v50 = vpop.f32.mrf.mxu0  ;;  %v1189_v57 = vpack.c.bf16 %v1163_v44, %v1162_v42 }
 0x2ac   : > { %2798 = vtanh.f32 %v1085_v47  ;;  %v1077_v51 = vadd.f32 %v3169_v31, %v1076_v50  ;;  %1234 = vrot.lane.b32.xlu1 %v1145_v48, %s2900_s11  ;;  %v1144_v52 = vpack.c.bf16 %v2787_v49, %v2785_v46  ;;  %v1164_v48 = vld [vmem:[%s3236_s30 + $0x60] sm:$0xff]  ;;  %v1165_v49 = vld [vmem:[%s3236_s30 + $0x68] sm:$0xff] }
 0x2ad   : > { %2800 = vtanh.f32 %v1074_v45  ;;  %v2560_v53 = vpop.f32.mrf.mxu0  ;;  %v2789_v56 = vpop.eup %2788 }
 0x2ae   : > { %2802 = vtanh.f32 %v1077_v51  ;;  %1232 = vrot.lane.b32.xlu0 %v1144_v52, %s2900_s11  ;;  %v1098_v54 = vadd.f32 %v2560_v53, %v3169_v31  ;;  %v1190_v51 = vpack.c.bf16 %v1165_v49, %v1164_v48  ;;  %v1166_v52 = vld [vmem:[%s3236_s30 + $0x70] sm:$0xff]  ;;  %v1167_v53 = vld [vmem:[%s3236_s30 + $0x78] sm:$0xff] }
 0x2af   : > { %v1089_v55 = vpop.f32.mrf.mxu0 }
 0x2b0   : > { %v1090_v59 = vadd.f32 %v3169_v31, %v1089_v55  ;;  %2804 = vtanh.f32 %v1098_v54  ;;  %v1191_v55 = vpack.c.bf16 %v1167_v53, %v1166_v52 }
 0x2b1   : > { %v2791_v58 = vpop.eup %2790  ;;  %v2561_v60 = vpop.f32.mrf.mxu0 }
 0x2b2   : > { %v2793_v62 = vpop.eup %2792  ;;  %v1101_v63 = vadd.f32 %v2561_v60, %v3169_v31  ;;  %v1147_v0 = vpack.c.bf16 %v2791_v58, %v2789_v56  ;;  %v1169_v60 = vld [vmem:[%s3236_s30 + $0x88] sm:$0xff] }
 0x2b3   : > { %v2795_v1 = vpop.eup %2794  ;;  %v1092_v2 = vpop.f32.mrf.mxu0 }
 0x2b4   : > { %2806 = vtanh.f32 %v1101_v63  ;;  %v1093_v3 = vadd.f32 %v3169_v31, %v1092_v2  ;;  %1238 = vrot.lane.b32.xlu1 %v1147_v0, %s2900_s11  ;;  %v1146_v4 = vpack.c.bf16 %v2795_v1, %v2793_v62  ;;  %v2744_v31 = vld [vmem:[%s3601_s3 + $0x60] sm:$0xff]   ;;  %v1170_v0 = vld [vmem:[%s3236_s30 + $0x90] sm:$0xff]  ;;  %v1171_v1 = vld [vmem:[%s3236_s30 + $0x98] sm:$0xff] }
 0x2b5   : > { %2808 = vtanh.f32 %v1090_v59  ;;  %v2797_v5 = vpop.eup %2796  ;;  %2600 = vmatprep.subr.bf16.mxu0 %v2744_v31  ;;  %v1168_v59 = vld [vmem:[%s3236_s30 + $0x80] sm:$0xff] }
 0x2b6   : > { %2810 = vtanh.f32 %v1093_v3  ;;  %1236 = vrot.lane.b32.xlu0 %v1146_v4, %s2900_s11  ;;  %2601 = vmatpush3.bf16.msra.mxu0 %v2744_v31  ;;  %v1192_v63 = vpack.c.bf16 %v1169_v60, %v1168_v59  ;;  %v1193_v3 = vpack.c.bf16 %v1171_v1, %v1170_v0  ;;  %v1175_v31 = vld [vmem:[%s3236_s30 + $0xb8] sm:$0xff] }
 0x2b7   : > { %2602 = vmatprep.subr.bf16.mxu0 %v2745_v12 }
 0x2b9   : > { %v2799_v7 = vpop.eup %2798 }
 0x2ba   : > { %v2801_v8 = vpop.eup %2800  ;;  %v1149_v9 = vpack.c.bf16 %v2799_v7, %v2797_v5  ;;  %2603 = vmatpush3.bf16.msra.mxu0 %v2745_v12  ;;  %v1172_v7 = vld [vmem:[%s3236_s30 + $0xa0] sm:$0xff] }
 0x2bb   : > { %v2803_v10 = vpop.eup %2802  ;;  %2604 = vmatprep.subr.bf16.mxu0 %v2746_v17 }
 0x2bc   : > { %1242 = vrot.lane.b32.xlu1 %v1149_v9, %s2900_s11  ;;  %v1148_v11 = vpack.c.bf16 %v2803_v10, %v2801_v8  ;;  %v1173_v8 = vld [vmem:[%s3236_s30 + $0xa8] sm:$0xff] }
 0x2bd   : > { %v2805_v13 = vpop.eup %2804  ;;  %v1194_v10 = vpack.c.bf16 %v1173_v8, %v1172_v7 }
 0x2be   : > { %1240 = vrot.lane.b32.xlu0 %v1148_v11, %s2900_s11  ;;  %2605 = vmatpush3.bf16.msra.mxu0 %v2746_v17  ;;  %v1174_v11 = vld [vmem:[%s3236_s30 + $0xb0] sm:$0xff]  ;;  %v1177_v17 = vld [vmem:[%s3236_s30 + $0xc8] sm:$0xff] }
 0x2bf   : > { %2606 = vmatprep.subr.bf16.mxu0 %v2747_v19 }
 0x2c1   : > { %v2807_v14 = vpop.eup %2806 }
 0x2c2   : > { %v2809_v16 = vpop.eup %2808  ;;  %v1151_v61 = vpack.c.bf16 %v2807_v14, %v2805_v13  ;;  %2607 = vmatpush3.bf16.msra.mxu0 %v2747_v19  ;;  %v1195_v13 = vpack.c.bf16 %v1175_v31, %v1174_v11  ;;  %v1178_v19 = vld [vmem:[%s3236_s30 + $0xd0] sm:$0xff] }
 0x2c3   : > { %v2811_v6 = vpop.eup %2810 }
 0x2c4   : > { %1246 = vrot.lane.b32.xlu1 %v1151_v61, %s2900_s11  ;;  %v1150_v18 = vpack.c.bf16 %v2811_v6, %v2809_v16  ;;  %v1176_v61 = vld [vmem:[%s3236_s30 + $0xc0] sm:$0xff] }
 0x2c6   : > { %1244 = vrot.lane.b32.xlu0 %v1150_v18, %s2900_s11  ;;  %v1196_v18 = vpack.c.bf16 %v1177_v17, %v1176_v61  ;;  %s2358_s11 = sshll.u32 (%p2951_p4), %s2939_s18, 8 }
 0x2c7   : > { %s3466_s14 = scalar_lea.vmem (%p2951_p4), %s3602_s4, %s2358_s11  }
 0x300   : > { %v1217_v26 = vpop.permute.xlu0 %1216 }
 0x301   : > { %v1250_v27 = vsel %vm614_vm2, %v1184_v22, %v1217_v26  ;;  %v1197_v22 = vpack.c.bf16 %v1179_v20, %v1178_v19  ;;  %v1180_v26 = vld [vmem:[%s3236_s30 + $0xe0] sm:$0xff] }
 0x302   : > { %2568 = vmatprep.mubr.msk.bf16.mxu1 %vm1327_vm3, %v1250_v27  ;;  %v1181_v27 = vld [vmem:[%s3236_s30 + $0xe8] sm:$0xff] }
 0x303   : > { %v1198_v29 = vpack.c.bf16 %v1181_v27, %v1180_v26 }
 0x304   : > { %v1219_v43 = vpop.permute.xlu0 %1218 }
 0x305   : > { %v1253_v24 = vsel %vm614_vm2, %v1185_v28, %v1219_v43  ;;  %v1183_v43 = vld [vmem:[%s3236_s30 + $0xf8] sm:$0xff] }
 0x306   : > { %2569 = vmatmul.mubr.msk.bf16.vlgmr.msra.gmra.mxu1 %vm1327_vm3, %v1253_v24 }
 0x308   : > { %v1221_v35 = vpop.permute.xlu1 %1220 }
 0x309   : > { %v1256_v36 = vsel %vm614_vm2, %v1186_v30, %v1221_v35  ;;  %v1199_v30 = vpack.c.bf16 %v1183_v43, %v1182_v15 }
 0x30a   : > { %2572 = vmatprep.mubr.msk.bf16.mxu1 %vm1327_vm3, %v1256_v36 }
 0x30c   : > { %v1223_v39 = vpop.permute.xlu1 %1222 }
 0x30d   : > { %v1259_v40 = vsel %vm614_vm2, %v1187_v37, %v1223_v39 }
 0x30e   : > { %2573 = vmatmul.mubr.msk.bf16.gmra.mxu1 %vm1327_vm3, %v1259_v40 }
 0x310   : > { %v1225_v45 = vpop.permute.xlu0 %1224  ;;  %v1227_v47 = vpop.permute.xlu1 %1226 }
 0x311   : > { %v1262_v46 = vsel %vm614_vm2, %v1188_v41, %v1225_v45  ;;  %v1265_v50 = vsel %vm614_vm2, %v1189_v57, %v1227_v47 }
 0x312   : > { %2576 = vmatprep.mubr.msk.bf16.mxu1 %vm1327_vm3, %v1262_v46 }
 0x316   : > { %2577 = vmatmul.mubr.msk.bf16.gmra.mxu1 %vm1327_vm3, %v1265_v50  ;;  %v1231_v58 = vpop.permute.xlu1 %1230 }
 0x317   : > { %v1271_v62 = vsel %vm614_vm2, %v1191_v55, %v1231_v58 }
 0x318   : > { %v1229_v54 = vpop.permute.xlu0 %1228 }
 0x319   : > { %v1268_v56 = vsel %vm614_vm2, %v1190_v51, %v1229_v54 }
 0x31a   : > { %2580 = vmatprep.mubr.msk.bf16.mxu1 %vm1327_vm3, %v1268_v56 }
 0x31e   : > { %2581 = vmatmul.mubr.msk.bf16.gmra.mxu1 %vm1327_vm3, %v1271_v62  ;;  %v1235_v5 = vpop.permute.xlu1 %1234 }
 0x31f   : > { %v1277_v9 = vsel %vm614_vm2, %v1193_v3, %v1235_v5 }
 0x320   : > { %v1233_v2 = vpop.permute.xlu0 %1232 }
 0x321   : > { %v1274_v4 = vsel %vm614_vm2, %v1192_v63, %v1233_v2 }
 0x322   : > { %2584 = vmatprep.mubr.msk.bf16.mxu1 %vm1327_vm3, %v1274_v4 }
 0x326   : > { %2585 = vmatmul.mubr.msk.bf16.gmra.mxu1 %vm1327_vm3, %v1277_v9  ;;  %v1239_v16 = vpop.permute.xlu1 %1238 }
 0x327   : > { %v1283_v6 = vsel %vm614_vm2, %v1195_v13, %v1239_v16 }
 0x328   : > { %v1237_v12 = vpop.permute.xlu0 %1236 }
 0x329   : > { %v1280_v14 = vsel %vm614_vm2, %v1194_v10, %v1237_v12 }
 0x32a   : > { %2588 = vmatprep.mubr.msk.bf16.mxu1 %vm1327_vm3, %v1280_v14 }
 0x32e   : > { %2589 = vmatmul.mubr.msk.bf16.gmra.mxu1 %vm1327_vm3, %v1283_v6  ;;  %v1243_v25 = vpop.permute.xlu1 %1242 }
 0x32f   : > { %v1289_v28 = vsel %vm614_vm2, %v1197_v22, %v1243_v25 }
 0x330   : > { %v1241_v21 = vpop.permute.xlu0 %1240 }
 0x331   : > { %v1286_v23 = vsel %vm614_vm2, %v1196_v18, %v1241_v21 }
 0x332   : > { %2592 = vmatprep.mubr.msk.bf16.mxu1 %vm1327_vm3, %v1286_v23 }
 0x336   : > { %2593 = vmatmul.mubr.msk.bf16.gmra.mxu1 %vm1327_vm3, %v1289_v28  ;;  %v1247_v33 = vpop.permute.xlu1 %1246 }
 0x337   : > { %v1295_v35 = vsel %vm614_vm2, %v1199_v30, %v1247_v33 }
 0x338   : > { %v1245_v24 = vpop.permute.xlu0 %1244 }
 0x339   : > { %v1292_v32 = vsel %vm614_vm2, %v1198_v29, %v1245_v24 }
 0x33a   : > { %2596 = vmatprep.mubr.msk.bf16.mxu1 %vm1327_vm3, %v1292_v32 }
 0x33e   : > { %2597 = vmatmul.mubr.msk.bf16.gmra.mxu1 %vm1327_vm3, %v1295_v35 }
 0x3c6   : > { %v2570_v36 = vpop.f32.mrf.mxu1 }
 0x3c7   : > { %v1403_v41 = vadd.f32 %v2570_v36, %v3305_v38 }
 0x3c8   : > { %v1394_v37 = vpop.f32.mrf.mxu1 }
 0x3c9   : > { %v1395_v39 = vadd.f32 %v3305_v38, %v1394_v37  ;;  %v1523_v48 = vmax.f32 %v1403_v41, 0.0 }
 0x3ca   : > { %v2571_v34 = vpop.f32.mrf.mxu1 }
 0x3cb   : > { %v1406_v40 = vadd.f32 %v2571_v34, %v3305_v38  ;;  %v1521_v46 = vmax.f32 %v1395_v39, 0.0 }
 0x3cc   : > { %v1397_v42 = vpop.f32.mrf.mxu1 }
 0x3cd   : > { %v1398_v44 = vadd.f32 %v3305_v38, %v1397_v42  ;;  %v1524_v45 = vmax.f32 %v1406_v40, 0.0 }
 0x3ce   : > { %v2574_v57 = vpop.f32.mrf.mxu1 }
 0x3cf   : > { %v1522_v47 = vmax.f32 %v1398_v44, 0.0  ;;  %v1554_v51 = vpack.c.bf16 %v1524_v45, %v1523_v48  ;;  %v1419_v55 = vadd.f32 %v2574_v57, %v3305_v38 }
 0x3d0   : > { %v1410_v49 = vpop.f32.mrf.mxu1 }
 0x3d1   : > { %v1553_v50 = vpack.c.bf16 %v1522_v47, %v1521_v46  ;;  %v1411_v53 = vadd.f32 %v3305_v38, %v1410_v49  ;;  %v1527_v0 = vmax.f32 %v1419_v55, 0.0 }
 0x3d2   : > { %v2575_v52 = vpop.f32.mrf.mxu1 }
 0x3d3   : > { %v1422_v54 = vadd.f32 %v2575_v52, %v3305_v38  ;;  %2608 = vmatprep.mubr.msk.bf16.mxu0 %vm1608_vm4, %v1553_v50  ;;  %v1525_v62 = vmax.f32 %v1411_v53, 0.0 }
 0x3d4   : > { %v1413_v56 = vpop.f32.mrf.mxu1  ;;  %2609 = vmatmul.mubr.msk.bf16.vlgmr.msra.gmra.mxu0 %vm1608_vm4, %v1554_v51 }
 0x3d5   : > { %v1414_v58 = vadd.f32 %v3305_v38, %v1413_v56  ;;  %v1528_v59 = vmax.f32 %v1422_v54, 0.0 }
 0x3d6   : > { %v2578_v60 = vpop.f32.mrf.mxu1 }
 0x3d7   : > { %v1526_v63 = vmax.f32 %v1414_v58, 0.0  ;;  %v1556_v3 = vpack.c.bf16 %v1528_v59, %v1527_v0  ;;  %v1435_v8 = vadd.f32 %v2578_v60, %v3305_v38 }
 0x3d8   : > { %v1426_v1 = vpop.f32.mrf.mxu1 }
 0x3d9   : > { %v1555_v2 = vpack.c.bf16 %v1526_v63, %v1525_v62  ;;  %v1427_v5 = vadd.f32 %v3305_v38, %v1426_v1  ;;  %v1531_v14 = vmax.f32 %v1435_v8, 0.0 }
 0x3da   : > { %v2579_v4 = vpop.f32.mrf.mxu1 }
 0x3db   : > { %v1438_v7 = vadd.f32 %v2579_v4, %v3305_v38  ;;  %2612 = vmatprep.mubr.msk.bf16.mxu0 %vm1608_vm4, %v1555_v2  ;;  %v1529_v12 = vmax.f32 %v1427_v5, 0.0 }
 0x3dc   : > { %v1429_v9 = vpop.f32.mrf.mxu1  ;;  %2613 = vmatmul.mubr.msk.bf16.gmra.mxu0 %vm1608_vm4, %v1556_v3 }
 0x3dd   : > { %v1430_v10 = vadd.f32 %v3305_v38, %v1429_v9  ;;  %v1532_v11 = vmax.f32 %v1438_v7, 0.0 }
 0x3de   : > { %v2582_v31 = vpop.f32.mrf.mxu1 }
 0x3df   : > { %v1530_v13 = vmax.f32 %v1430_v10, 0.0  ;;  %v1558_v17 = vpack.c.bf16 %v1532_v11, %v1531_v14  ;;  %v1451_v20 = vadd.f32 %v2582_v31, %v3305_v38 }
 0x3e0   : > { %v1442_v16 = vpop.f32.mrf.mxu1 }
 0x3e1   : > { %v1557_v61 = vpack.c.bf16 %v1530_v13, %v1529_v12  ;;  %v1443_v18 = vadd.f32 %v3305_v38, %v1442_v16  ;;  %v1535_v28 = vmax.f32 %v1451_v20, 0.0 }
 0x3e2   : > { %v2583_v6 = vpop.f32.mrf.mxu1 }
 0x3e3   : > { %v1454_v19 = vadd.f32 %v2583_v6, %v3305_v38  ;;  %2616 = vmatprep.mubr.msk.bf16.mxu0 %vm1608_vm4, %v1557_v61  ;;  %v1533_v26 = vmax.f32 %v1443_v18, 0.0 }
 0x3e4   : > { %v1445_v21 = vpop.f32.mrf.mxu1  ;;  %2617 = vmatmul.mubr.msk.bf16.gmra.mxu0 %vm1608_vm4, %v1558_v17 }
 0x3e5   : > { %v1446_v22 = vadd.f32 %v3305_v38, %v1445_v21  ;;  %v1536_v23 = vmax.f32 %v1454_v19, 0.0 }
 0x3e6   : > { %v2586_v25 = vpop.f32.mrf.mxu1 }
 0x3e7   : > { %v1534_v27 = vmax.f32 %v1446_v22, 0.0  ;;  %v1560_v43 = vpack.c.bf16 %v1536_v23, %v1535_v28  ;;  %v1467_v33 = vadd.f32 %v2586_v25, %v3305_v38  ;;  %v3359_v22 = vld [vmem:[%s3600_s2 + $0x4] ss:$0 sm:$0xff] }
 0x3e8   : > { %v1458_v29 = vpop.f32.mrf.mxu1 }
 0x3e9   : > { %v1559_v15 = vpack.c.bf16 %v1534_v27, %v1533_v26  ;;  %v1459_v30 = vadd.f32 %v3305_v38, %v1458_v29  ;;  %v1539_v41 = vmax.f32 %v1467_v33, 0.0 }
 0x3ea   : > { %v2587_v24 = vpop.f32.mrf.mxu1 }
 0x3eb   : > { %v1470_v32 = vadd.f32 %v2587_v24, %v3305_v38  ;;  %2620 = vmatprep.mubr.msk.bf16.mxu0 %vm1608_vm4, %v1559_v15  ;;  %v1537_v39 = vmax.f32 %v1459_v30, 0.0 }
 0x3ec   : > { %v1461_v35 = vpop.f32.mrf.mxu1  ;;  %2621 = vmatmul.mubr.msk.bf16.gmra.mxu0 %vm1608_vm4, %v1560_v43 }
 0x3ed   : > { %v1462_v36 = vadd.f32 %v3305_v38, %v1461_v35  ;;  %v1540_v37 = vmax.f32 %v1470_v32, 0.0 }
 0x3ee   : > { %v2590_v34 = vpop.f32.mrf.mxu1 }
 0x3ef   : > { %v1538_v40 = vmax.f32 %v1462_v36, 0.0  ;;  %v1562_v45 = vpack.c.bf16 %v1540_v37, %v1539_v41  ;;  %v1483_v48 = vadd.f32 %v2590_v34, %v3305_v38 }
 0x3f0   : > { %v1474_v42 = vpop.f32.mrf.mxu1 }
 0x3f1   : > { %v1561_v44 = vpack.c.bf16 %v1538_v40, %v1537_v39  ;;  %v1475_v46 = vadd.f32 %v3305_v38, %v1474_v42  ;;  %v1543_v55 = vmax.f32 %v1483_v48, 0.0 }
 0x3f2   : > { %v2591_v57 = vpop.f32.mrf.mxu1 }
 0x3f3   : > { %v1486_v47 = vadd.f32 %v2591_v57, %v3305_v38  ;;  %2624 = vmatprep.mubr.msk.bf16.mxu0 %vm1608_vm4, %v1561_v44  ;;  %v1541_v53 = vmax.f32 %v1475_v46, 0.0 }
 0x3f4   : > { %v1477_v49 = vpop.f32.mrf.mxu1  ;;  %2625 = vmatmul.mubr.msk.bf16.gmra.mxu0 %vm1608_vm4, %v1562_v45 }
 0x3f5   : > { %v1478_v50 = vadd.f32 %v3305_v38, %v1477_v49  ;;  %v1544_v51 = vmax.f32 %v1486_v47, 0.0 }
 0x3f6   : > { %v2594_v52 = vpop.f32.mrf.mxu1 }
 0x3f7   : > { %v1542_v54 = vmax.f32 %v1478_v50, 0.0  ;;  %v1564_v59 = vpack.c.bf16 %v1544_v51, %v1543_v55  ;;  %v1499_v0 = vadd.f32 %v2594_v52, %v3305_v38 }
 0x3f8   : > { %v1490_v56 = vpop.f32.mrf.mxu1 }
 0x3f9   : > { %v1563_v58 = vpack.c.bf16 %v1542_v54, %v1541_v53  ;;  %v1491_v62 = vadd.f32 %v3305_v38, %v1490_v56  ;;  %v1547_v8 = vmax.f32 %v1499_v0, 0.0 }
 0x3fa   : > { %v2595_v60 = vpop.f32.mrf.mxu1 }
 0x3fb   : > { %v1502_v63 = vadd.f32 %v2595_v60, %v3305_v38  ;;  %2628 = vmatprep.mubr.msk.bf16.mxu0 %vm1608_vm4, %v1563_v58  ;;  %v1545_v5 = vmax.f32 %v1491_v62, 0.0 }
 0x3fc   : > { %v1493_v1 = vpop.f32.mrf.mxu1  ;;  %2629 = vmatmul.mubr.msk.bf16.gmra.mxu0 %vm1608_vm4, %v1564_v59 }
 0x3fd   : > { %v1494_v2 = vadd.f32 %v3305_v38, %v1493_v1  ;;  %v1548_v3 = vmax.f32 %v1502_v63, 0.0 }
 0x3fe   : > { %v2598_v4 = vpop.f32.mrf.mxu1 }
 0x3ff   : > { %v1546_v7 = vmax.f32 %v1494_v2, 0.0  ;;  %v1566_v11 = vpack.c.bf16 %v1548_v3, %v1547_v8  ;;  %v1515_v14 = vadd.f32 %v2598_v4, %v3305_v38 }
 0x400   : > { %v1506_v9 = vpop.f32.mrf.mxu1 }
 0x401   : > { %v1565_v10 = vpack.c.bf16 %v1546_v7, %v1545_v5  ;;  %v1507_v12 = vadd.f32 %v3305_v38, %v1506_v9  ;;  %v1551_v19 = vmax.f32 %v1515_v14, 0.0 }
 0x402   : > { %v2599_v31 = vpop.f32.mrf.mxu1 }
 0x403   : > { %v1518_v13 = vadd.f32 %v2599_v31, %v3305_v38  ;;  %2632 = vmatprep.mubr.msk.bf16.mxu0 %vm1608_vm4, %v1565_v10  ;;  %v1549_v6 = vmax.f32 %v1507_v12, 0.0 }
 0x404   : > { %v1509_v16 = vpop.f32.mrf.mxu1  ;;  %2633 = vmatmul.mubr.msk.bf16.gmra.mxu0 %vm1608_vm4, %v1566_v11 }
 0x405   : > { %v1510_v61 = vadd.f32 %v3305_v38, %v1509_v16  ;;  %v1552_v17 = vmax.f32 %v1518_v13, 0.0 }
 0x407   : > { %v1550_v18 = vmax.f32 %v1510_v61, 0.0  ;;  %v1568_v21 = vpack.c.bf16 %v1552_v17, %v1551_v19 }
 0x409   : > { %v1567_v20 = vpack.c.bf16 %v1550_v18, %v1549_v6 }
 0x40b   : > { %2636 = vmatprep.mubr.msk.bf16.mxu0 %vm1608_vm4, %v1567_v20 }
 0x40c   : > { %2637 = vmatmul.mubr.msk.bf16.gmra.mxu0 %vm1608_vm4, %v1568_v21 }
 0x494   : > { %v2610_v23 = vpop.f32.mrf.mxu0 }
 0x495   : > { %v1700_v38 = vadd.f32 %v2610_v23, %v3359_v22 }
 0x496   : > { %v1691_v25 = vpop.f32.mrf.mxu0 }
 0x497   : > { %v1820_v26 = vmax.f32 %v1700_v38, 0.0  ;;  %v1692_v27 = vadd.f32 %v3359_v22, %v1691_v25 }
 0x498   : > { %v2611_v28 = vpop.f32.mrf.mxu0 }
 0x499   : > { %1852 = vst.msk [vmem:[%s3363_s10 + $0x10] sm:$0xff] %vm614_vm2, %v1820_v26  ;;  %v1818_v29 = vmax.f32 %v1692_v27, 0.0  ;;  %v1703_v15 = vadd.f32 %v2611_v28, %v3359_v22 }
 0x49a   : > { %v1694_v43 = vpop.f32.mrf.mxu0 }
 0x49b   : > { %1850 = vst.msk [vmem:[%s3363_s10] sm:$0xff] %vm614_vm2, %v1818_v29  ;;  %v1821_v24 = vmax.f32 %v1703_v15, 0.0  ;;  %v1695_v30 = vadd.f32 %v3359_v22, %v1694_v43 }
 0x49c   : > { %v2614_v32 = vpop.f32.mrf.mxu0 }
 0x49d   : > { %1853 = vst.msk [vmem:[%s3363_s10 + $0x18] sm:$0xff] %vm614_vm2, %v1821_v24  ;;  %v1819_v33 = vmax.f32 %v1695_v30, 0.0  ;;  %v1716_v35 = vadd.f32 %v2614_v32, %v3359_v22 }
 0x49e   : > { %v1707_v36 = vpop.f32.mrf.mxu0 }
 0x49f   : > { %1851 = vst.msk [vmem:[%s3363_s10 + $0x8] sm:$0xff] %vm614_vm2, %v1819_v33  ;;  %v1824_v37 = vmax.f32 %v1716_v35, 0.0  ;;  %v1708_v34 = vadd.f32 %v3359_v22, %v1707_v36 }
 0x4a0   : > { %v2615_v39 = vpop.f32.mrf.mxu0 }
 0x4a1   : > { %1856 = vst.msk [vmem:[%s3363_s10 + $0x30] sm:$0xff] %vm614_vm2, %v1824_v37  ;;  %v1822_v40 = vmax.f32 %v1708_v34, 0.0  ;;  %v1719_v41 = vadd.f32 %v2615_v39, %v3359_v22 }
 0x4a2   : > { %v1710_v42 = vpop.f32.mrf.mxu0 }
 0x4a3   : > { %1854 = vst.msk [vmem:[%s3363_s10 + $0x20] sm:$0xff] %vm614_vm2, %v1822_v40  ;;  %v1825_v44 = vmax.f32 %v1719_v41, 0.0  ;;  %v1711_v45 = vadd.f32 %v3359_v22, %v1710_v42 }
 0x4a4   : > { %v2618_v57 = vpop.f32.mrf.mxu0 }
 0x4a5   : > { %1857 = vst.msk [vmem:[%s3363_s10 + $0x38] sm:$0xff] %vm614_vm2, %v1825_v44  ;;  %v1823_v46 = vmax.f32 %v1711_v45, 0.0  ;;  %v1732_v47 = vadd.f32 %v2618_v57, %v3359_v22 }
 0x4a6   : > { %v1723_v48 = vpop.f32.mrf.mxu0 }
 0x4a7   : > { %1855 = vst.msk [vmem:[%s3363_s10 + $0x28] sm:$0xff] %vm614_vm2, %v1823_v46  ;;  %v1828_v49 = vmax.f32 %v1732_v47, 0.0  ;;  %v1724_v50 = vadd.f32 %v3359_v22, %v1723_v48 }
 0x4a8   : > { %v2619_v51 = vpop.f32.mrf.mxu0 }
 0x4a9   : > { %1860 = vst.msk [vmem:[%s3363_s10 + $0x50] sm:$0xff] %vm614_vm2, %v1828_v49  ;;  %v1826_v52 = vmax.f32 %v1724_v50, 0.0  ;;  %v1735_v53 = vadd.f32 %v2619_v51, %v3359_v22 }
 0x4aa   : > { %v1726_v54 = vpop.f32.mrf.mxu0 }
 0x4ab   : > { %1858 = vst.msk [vmem:[%s3363_s10 + $0x40] sm:$0xff] %vm614_vm2, %v1826_v52  ;;  %v1829_v55 = vmax.f32 %v1735_v53, 0.0  ;;  %v1727_v56 = vadd.f32 %v3359_v22, %v1726_v54 }
 0x4ac   : > { %v2622_v58 = vpop.f32.mrf.mxu0 }
 0x4ad   : > { %1861 = vst.msk [vmem:[%s3363_s10 + $0x58] sm:$0xff] %vm614_vm2, %v1829_v55  ;;  %v1827_v59 = vmax.f32 %v1727_v56, 0.0  ;;  %v1748_v60 = vadd.f32 %v2622_v58, %v3359_v22 }
 0x4ae   : > { %v1739_v62 = vpop.f32.mrf.mxu0 }
 0x4af   : > { %1859 = vst.msk [vmem:[%s3363_s10 + $0x48] sm:$0xff] %vm614_vm2, %v1827_v59  ;;  %v1832_v63 = vmax.f32 %v1748_v60, 0.0  ;;  %v1740_v0 = vadd.f32 %v3359_v22, %v1739_v62 }
 0x4b0   : > { %v2623_v1 = vpop.f32.mrf.mxu0 }
 0x4b1   : > { %1864 = vst.msk [vmem:[%s3363_s10 + $0x70] sm:$0xff] %vm614_vm2, %v1832_v63  ;;  %v1830_v2 = vmax.f32 %v1740_v0, 0.0  ;;  %v1751_v3 = vadd.f32 %v2623_v1, %v3359_v22 }
 0x4b2   : > { %v1742_v4 = vpop.f32.mrf.mxu0 }
 0x4b3   : > { %1862 = vst.msk [vmem:[%s3363_s10 + $0x60] sm:$0xff] %vm614_vm2, %v1830_v2  ;;  %v1833_v5 = vmax.f32 %v1751_v3, 0.0  ;;  %v1743_v7 = vadd.f32 %v3359_v22, %v1742_v4 }
 0x4b4   : > { %v2626_v8 = vpop.f32.mrf.mxu0 }
 0x4b5   : > { %1865 = vst.msk [vmem:[%s3363_s10 + $0x78] sm:$0xff] %vm614_vm2, %v1833_v5  ;;  %v1831_v9 = vmax.f32 %v1743_v7, 0.0  ;;  %v1764_v10 = vadd.f32 %v2626_v8, %v3359_v22 }
 0x4b6   : > { %v1755_v11 = vpop.f32.mrf.mxu0 }
 0x4b7   : > { %1863 = vst.msk [vmem:[%s3363_s10 + $0x68] sm:$0xff] %vm614_vm2, %v1831_v9  ;;  %v1836_v31 = vmax.f32 %v1764_v10, 0.0  ;;  %v1756_v12 = vadd.f32 %v3359_v22, %v1755_v11 }
 0x4b8   : > { %v2627_v13 = vpop.f32.mrf.mxu0 }
 0x4b9   : > { %1868 = vst.msk [vmem:[%s3363_s10 + $0x90] sm:$0xff] %vm614_vm2, %v1836_v31  ;;  %v1834_v14 = vmax.f32 %v1756_v12, 0.0  ;;  %v1767_v16 = vadd.f32 %v2627_v13, %v3359_v22 }
 0x4ba   : > { %v1758_v61 = vpop.f32.mrf.mxu0 }
 0x4bb   : > { %1866 = vst.msk [vmem:[%s3363_s10 + $0x80] sm:$0xff] %vm614_vm2, %v1834_v14  ;;  %v1837_v17 = vmax.f32 %v1767_v16, 0.0  ;;  %v1759_v6 = vadd.f32 %v3359_v22, %v1758_v61 }
 0x4bc   : > { %v2630_v18 = vpop.f32.mrf.mxu0 }
 0x4bd   : > { %1869 = vst.msk [vmem:[%s3363_s10 + $0x98] sm:$0xff] %vm614_vm2, %v1837_v17  ;;  %v1835_v19 = vmax.f32 %v1759_v6, 0.0  ;;  %v1780_v20 = vadd.f32 %v2630_v18, %v3359_v22 }
 0x4be   : > { %v1771_v21 = vpop.f32.mrf.mxu0 }
 0x4bf   : > { %1867 = vst.msk [vmem:[%s3363_s10 + $0x88] sm:$0xff] %vm614_vm2, %v1835_v19  ;;  %v1840_v23 = vmax.f32 %v1780_v20, 0.0  ;;  %v1772_v38 = vadd.f32 %v3359_v22, %v1771_v21 }
 0x4c0   : > { %v2631_v25 = vpop.f32.mrf.mxu0 }
 0x4c1   : > { %1872 = vst.msk [vmem:[%s3363_s10 + $0xb0] sm:$0xff] %vm614_vm2, %v1840_v23  ;;  %v1838_v26 = vmax.f32 %v1772_v38, 0.0  ;;  %v1783_v27 = vadd.f32 %v2631_v25, %v3359_v22 }
 0x4c2   : > { %v1774_v28 = vpop.f32.mrf.mxu0 }
 0x4c3   : > { %1870 = vst.msk [vmem:[%s3363_s10 + $0xa0] sm:$0xff] %vm614_vm2, %v1838_v26  ;;  %v1841_v29 = vmax.f32 %v1783_v27, 0.0  ;;  %v1775_v15 = vadd.f32 %v3359_v22, %v1774_v28 }
 0x4c4   : > { %v2634_v43 = vpop.f32.mrf.mxu0 }
 0x4c5   : > { %1873 = vst.msk [vmem:[%s3363_s10 + $0xb8] sm:$0xff] %vm614_vm2, %v1841_v29  ;;  %v1839_v24 = vmax.f32 %v1775_v15, 0.0  ;;  %v1796_v30 = vadd.f32 %v2634_v43, %v3359_v22 }
 0x4c6   : > { %v1787_v32 = vpop.f32.mrf.mxu0 }
 0x4c7   : > { %1871 = vst.msk [vmem:[%s3363_s10 + $0xa8] sm:$0xff] %vm614_vm2, %v1839_v24  ;;  %v1844_v33 = vmax.f32 %v1796_v30, 0.0  ;;  %v1788_v35 = vadd.f32 %v3359_v22, %v1787_v32 }
 0x4c8   : > { %v2635_v36 = vpop.f32.mrf.mxu0 }
 0x4c9   : > { %1876 = vst.msk [vmem:[%s3363_s10 + $0xd0] sm:$0xff] %vm614_vm2, %v1844_v33  ;;  %v1842_v37 = vmax.f32 %v1788_v35, 0.0  ;;  %v1799_v34 = vadd.f32 %v2635_v36, %v3359_v22 }
 0x4ca   : > { %v1790_v39 = vpop.f32.mrf.mxu0 }
 0x4cb   : > { %1874 = vst.msk [vmem:[%s3363_s10 + $0xc0] sm:$0xff] %vm614_vm2, %v1842_v37  ;;  %v1845_v40 = vmax.f32 %v1799_v34, 0.0  ;;  %v1791_v41 = vadd.f32 %v3359_v22, %v1790_v39 }
 0x4cc   : > { %v2638_v42 = vpop.f32.mrf.mxu0 }
 0x4cd   : > { %1877 = vst.msk [vmem:[%s3363_s10 + $0xd8] sm:$0xff] %vm614_vm2, %v1845_v40  ;;  %v1843_v44 = vmax.f32 %v1791_v41, 0.0  ;;  %v1812_v45 = vadd.f32 %v2638_v42, %v3359_v22 }
 0x4ce   : > { %v1803_v57 = vpop.f32.mrf.mxu0 }
 0x4cf   : > { %1875 = vst.msk [vmem:[%s3363_s10 + $0xc8] sm:$0xff] %vm614_vm2, %v1843_v44  ;;  %v1848_v46 = vmax.f32 %v1812_v45, 0.0  ;;  %v1804_v47 = vadd.f32 %v3359_v22, %v1803_v57 }
 0x4d0   : > { %v2639_v48 = vpop.f32.mrf.mxu0 }
 0x4d1   : > { %1880 = vst.msk [vmem:[%s3363_s10 + $0xf0] sm:$0xff] %vm614_vm2, %v1848_v46  ;;  %v1846_v49 = vmax.f32 %v1804_v47, 0.0  ;;  %v1815_v50 = vadd.f32 %v2639_v48, %v3359_v22 }
 0x4d2   : > { %v1806_v51 = vpop.f32.mrf.mxu0 }
 0x4d3   : > { %1878 = vst.msk [vmem:[%s3363_s10 + $0xe0] sm:$0xff] %vm614_vm2, %v1846_v49  ;;  %v1849_v52 = vmax.f32 %v1815_v50, 0.0  ;;  %v1807_v53 = vadd.f32 %v3359_v22, %v1806_v51  ;;  %1888 = sbr.rel (!%p2951_p4) target bundleno = 1288 (0x508), region = 40 }
 0x4d5   : > { %1881 = vst.msk [vmem:[%s3363_s10 + $0xf8] sm:$0xff] %vm614_vm2, %v1849_v52  ;;  %v1847_v54 = vmax.f32 %v1807_v53, 0.0 }
 0x4d7   : > { %1879 = vst.msk [vmem:[%s3363_s10 + $0xe8] sm:$0xff] %vm614_vm2, %v1847_v54 }
 0x4d8   : > { %s3613_s15 = smov (!%p1891_p8, %s1890_s15), 32 }
 0x4d9   : > { %s2343_s17 = sshll.u32 %s3613_s15, 7 }
 0x4da   : > { %p2346_p9 = scmp.eq.s32.totalorder %s2343_s17, 0 }
 0x4db   : > { %s3472_s20 = sshrl.u32 (!%p2346_p9), %s3613_s15, 5 }
 0x4dc   : > { %1899 = sbr.rel (%p2346_p9) target bundleno = 1288 (0x508), region = 44  ;;  %p2347_p10 = scmp.le.s32.totalorder (!%p2346_p9), %s3472_s20, 0 }
 0x4e1   : > { %2184 = sbr.rel (%p2347_p10) target bundleno = 1271 (0x4f7), region = 123  ;;  %s3604_s18 = smov (!%p2347_p10), %s3466_s14 }
 0x4e2   : > { %s3605_s23 = smov (!%p2347_p10), %s3363_s10  ;;  %s3481_s28 = smov (!%p2347_p10), 0  }
 0x4e3   : > { %s3483_s21 = smov (!%p2347_p10), 0  }
 0x4e6 LB: >> { %v2024_v22 = vld [vmem:[%s2874_s23] sm:$0xff]  ;;  %v2026_v55 = vld [vmem:[%s2874_s23 + $0x8] sm:$0xff]  ;;  %v2028_v56 = vld [vmem:[%s2874_s23 + $0x10] sm:$0xff]  ;;  %s2088_s24 = sadd.s32 1, %s2878_s28  ;;  %s2018_s21 = sadd.s32 1, %s2882_s21   ;;  %s2882_s21 = sphi %s3483_s21, %s2018_s21   ;;  %s2878_s28 = sphi %s3481_s28, %s3608_s28   ;;  %s2874_s23 = sphi %s3605_s23, %s3607_s23   ;;  %s2870_s18 = sphi %s3604_s18, %s3606_s18  }
 0x4e7   : >> { %2025 = vst [vmem:[%s2870_s18] sm:$0xff] %v2024_v22  ;;  %2027 = vst [vmem:[%s2870_s18 + $0x8] sm:$0xff] %v2026_v55  ;;  %v2030_v58 = vld [vmem:[%s2874_s23 + $0x18] sm:$0xff]  ;;  %v2032_v59 = vld [vmem:[%s2874_s23 + $0x20] sm:$0xff]  ;;  %p2089_p11 = scmp.ge.s32.totalorder %s2088_s24, %s3472_s20  ;;  %p2017_p12 = scmp.ge.s32.totalorder %s2018_s21, %s3472_s20 }
 0x4e8   : >> { %2029 = vst [vmem:[%s2870_s18 + $0x10] sm:$0xff] %v2028_v56  ;;  %v2034_v60 = vld [vmem:[%s2874_s23 + $0x28] sm:$0xff]  ;;  %2031 = vst [vmem:[%s2870_s18 + $0x18] sm:$0xff] %v2030_v58  ;;  %v2036_v62 = vld [vmem:[%s2874_s23 + $0x30] sm:$0xff] }
 0x4e9   : >> { %2033 = vst [vmem:[%s2870_s18 + $0x20] sm:$0xff] %v2032_v59  ;;  %2035 = vst [vmem:[%s2870_s18 + $0x28] sm:$0xff] %v2034_v60  ;;  %v2038_v63 = vld [vmem:[%s2874_s23 + $0x38] sm:$0xff]  ;;  %v2040_v0 = vld [vmem:[%s2874_s23 + $0x40] sm:$0xff]  ;;  %s3615_s24 = smov (%p2089_p11, %s2088_s24), 0 }
 0x4ea   : >> { %2037 = vst [vmem:[%s2870_s18 + $0x30] sm:$0xff] %v2036_v62  ;;  %2039 = vst [vmem:[%s2870_s18 + $0x38] sm:$0xff] %v2038_v63  ;;  %v2042_v1 = vld [vmem:[%s2874_s23 + $0x48] sm:$0xff]  ;;  %v2044_v2 = vld [vmem:[%s2874_s23 + $0x50] sm:$0xff]  ;;  %s2348_s25 = sshll.u32 %s3615_s24, 8  ;;  %s3608_s28 = smov %s3615_s24 }
 0x4eb   : >> { %2041 = vst [vmem:[%s2870_s18 + $0x40] sm:$0xff] %v2040_v0  ;;  %v2046_v3 = vld [vmem:[%s2874_s23 + $0x58] sm:$0xff]  ;;  %2043 = vst [vmem:[%s2870_s18 + $0x48] sm:$0xff] %v2042_v1  ;;  %v2048_v4 = vld [vmem:[%s2874_s23 + $0x60] sm:$0xff]  ;;  %s3539_s26 = scalar_lea.vmem %s3363_s10, %s2348_s25 [#allocation2]   ;;  %s2094_s27 = scalar_lea.vmem %s3466_s14, %s2348_s25  }
 0x4ec   : >> { %2045 = vst [vmem:[%s2870_s18 + $0x50] sm:$0xff] %v2044_v2  ;;  %2047 = vst [vmem:[%s2870_s18 + $0x58] sm:$0xff] %v2046_v3  ;;  %v2050_v5 = vld [vmem:[%s2874_s23 + $0x68] sm:$0xff]  ;;  %v2052_v7 = vld [vmem:[%s2874_s23 + $0x70] sm:$0xff] }
 0x4ed   : >> { %2049 = vst [vmem:[%s2870_s18 + $0x60] sm:$0xff] %v2048_v4  ;;  %2051 = vst [vmem:[%s2870_s18 + $0x68] sm:$0xff] %v2050_v5  ;;  %v2054_v8 = vld [vmem:[%s2874_s23 + $0x78] sm:$0xff]  ;;  %v2056_v9 = vld [vmem:[%s2874_s23 + $0x80] sm:$0xff] }
 0x4ee   : >> { %2053 = vst [vmem:[%s2870_s18 + $0x70] sm:$0xff] %v2052_v7  ;;  %v2058_v10 = vld [vmem:[%s2874_s23 + $0x88] sm:$0xff]  ;;  %2055 = vst [vmem:[%s2870_s18 + $0x78] sm:$0xff] %v2054_v8  ;;  %v2060_v11 = vld [vmem:[%s2874_s23 + $0x90] sm:$0xff] }
 0x4ef   : >> { %2057 = vst [vmem:[%s2870_s18 + $0x80] sm:$0xff] %v2056_v9  ;;  %2059 = vst [vmem:[%s2870_s18 + $0x88] sm:$0xff] %v2058_v10  ;;  %v2062_v31 = vld [vmem:[%s2874_s23 + $0x98] sm:$0xff]  ;;  %v2064_v12 = vld [vmem:[%s2874_s23 + $0xa0] sm:$0xff] }
 0x4f0   : >> { %2061 = vst [vmem:[%s2870_s18 + $0x90] sm:$0xff] %v2060_v11  ;;  %2063 = vst [vmem:[%s2870_s18 + $0x98] sm:$0xff] %v2062_v31  ;;  %v2066_v13 = vld [vmem:[%s2874_s23 + $0xa8] sm:$0xff]  ;;  %v2068_v14 = vld [vmem:[%s2874_s23 + $0xb0] sm:$0xff] }
 0x4f1   : >> { %2065 = vst [vmem:[%s2870_s18 + $0xa0] sm:$0xff] %v2064_v12  ;;  %v2070_v16 = vld [vmem:[%s2874_s23 + $0xb8] sm:$0xff]  ;;  %2067 = vst [vmem:[%s2870_s18 + $0xa8] sm:$0xff] %v2066_v13  ;;  %v2072_v61 = vld [vmem:[%s2874_s23 + $0xc0] sm:$0xff] }
 0x4f2   : >> { %2069 = vst [vmem:[%s2870_s18 + $0xb0] sm:$0xff] %v2068_v14  ;;  %2071 = vst [vmem:[%s2870_s18 + $0xb8] sm:$0xff] %v2070_v16  ;;  %v2074_v17 = vld [vmem:[%s2874_s23 + $0xc8] sm:$0xff]  ;;  %v2076_v6 = vld [vmem:[%s2874_s23 + $0xd0] sm:$0xff]  ;;  %2020 = sbr.rel (!%p2017_p12) target bundleno = 1254 (0x4e6), region = 129 }
 0x4f3   : >> { %2073 = vst [vmem:[%s2870_s18 + $0xc0] sm:$0xff] %v2072_v61  ;;  %2075 = vst [vmem:[%s2870_s18 + $0xc8] sm:$0xff] %v2074_v17  ;;  %v2078_v18 = vld [vmem:[%s2874_s23 + $0xd8] sm:$0xff]  ;;  %v2080_v19 = vld [vmem:[%s2874_s23 + $0xe0] sm:$0xff] }
 0x4f4   : >> { %2077 = vst [vmem:[%s2870_s18 + $0xd0] sm:$0xff] %v2076_v6  ;;  %v2082_v20 = vld [vmem:[%s2874_s23 + $0xe8] sm:$0xff]  ;;  %2079 = vst [vmem:[%s2870_s18 + $0xd8] sm:$0xff] %v2078_v18  ;;  %v2084_v21 = vld [vmem:[%s2874_s23 + $0xf0] sm:$0xff] }
 0x4f5   : >> { %2081 = vst [vmem:[%s2870_s18 + $0xe0] sm:$0xff] %v2080_v19  ;;  %2083 = vst [vmem:[%s2870_s18 + $0xe8] sm:$0xff] %v2082_v20  ;;  %v2086_v23 = vld [vmem:[%s2874_s23 + $0xf8] sm:$0xff]  ;;  %s3607_s23 = smov %s3539_s26 }
 0x4f6   : >> { %2085 = vst [vmem:[%s2870_s18 + $0xf0] sm:$0xff] %v2084_v21  ;;  %2087 = vst [vmem:[%s2870_s18 + $0xf8] sm:$0xff] %v2086_v23  ;;  %s3606_s18 = smov %s2094_s27 }
 0x4f7 PF: > { %s3580_s30 = sand.u32 31, %s3613_s15   ;;  %s2359_s29 = sshll.u32 %s3472_s20, 8 }
 0x4f8   : > { %s2099_s6 = scalar_lea.vmem %s3363_s10, %s2359_s29 [#allocation2]   ;;  %s2101_s5 = scalar_lea.vmem %s3466_s14, %s2359_s29  }
 0x4f9   : > { %p2353_p13 = scmp.le.s32.totalorder %s3580_s30, 0 }
 0x4fa   : > { %s2884_s7 = smov (!%p2353_p13), %s2101_s5   ;;  %s2888_s8 = smov (!%p2353_p13), %s2099_s6  }
 0x4fb   : > { %2198 = sbr.rel (%p2353_p13) target bundleno = 1288 (0x508), region = 134  ;;  %s2892_s9 = smov (!%p2353_p13), 0  }
 0x4fc   : > { %s2896_s11 = smov (!%p2353_p13), 0  }
 0x500 LB: >> { %v2111_v38 = vld [vmem:[%s2890_s8] sm:$0xff]  ;;  %s2113_s15 = sadd.s32 1, %s2894_s9  ;;  %s2105_s11 = sadd.s32 1, %s2898_s11   ;;  %s2898_s11 = sphi %s2896_s11, %s2105_s11   ;;  %s2894_s9 = sphi %s2892_s9, %s2893_s9   ;;  %s2890_s8 = sphi %s2888_s8, %s2118_s8   ;;  %s2886_s7 = sphi %s2884_s7, %s2119_s7  }
 0x501   : >> { %2112 = vst [vmem:[%s2886_s7] sm:$0xff] %v2111_v38  ;;  %p2114_p0 = scmp.ge.s32.totalorder %s2113_s15, %s3580_s30  ;;  %p2104_p1 = scmp.ge.s32.totalorder %s2105_s11, %s3580_s30 }
 0x503   : >> { %s3617_s15 = smov (%p2114_p0, %s2113_s15), 0  ;;  %2107 = sbr.rel (!%p2104_p1) target bundleno = 1280 (0x500), region = 140 }
 0x504   : >> { %s2354_s10 = sshll.u32 %s3617_s15, 3  ;;  %s2893_s9 = smov %s3617_s15  }
 0x505   : >> { %s2118_s8 = scalar_lea.vmem %s2099_s6, %s2354_s10 [#allocation2]   ;;  %s2119_s7 = scalar_lea.vmem %s2101_s5, %s2354_s10  }
 0x508 PF: > { %p11_p2 = scmp.ge.s32.totalorder %s2941_s19, 4   ;;  %s3609_s15 = smov %s2862_s16 }
 0x509   : > { %s3610_s16 = smov %s2949_s22  ;;  %s3611_s17 = smov %s2941_s19 }
 0x50a   :  { %13 = sbr.rel (!%p11_p2) target bundleno = 2 (0x2), region = 151 }

</bundles_post_ra>
